<compile_context>
chip_gen: v7x
topology: tpu7x:2x2x1
jax: 0.10.0
libtpu: 0.0.40
codegen_flags: <defaults>
</compile_context>

<pallas_src>
import math
import functools

import jax
import jax.numpy as jnp
from jax import lax
from jax.experimental import pallas as pl
from jax.experimental.pallas import tpu as pltpu


def bert_attention_kernel(
    x_ref, mask_ref,
    wqkv_ref, bqkv_ref,
    wo_ref, bo_ref, gamma_ref, beta_ref,
    out_ref,
    qkv_vmem, ctx_vmem,
    *, num_heads, head_dim, matmul_dtype,
):
    h = pl.program_id(1)
    dh = head_dim

    # ---- Phase 1 (once per batch element): fused full-width QKV projection.
    @pl.when(h == 0)
    def _():
        x = x_ref[...].astype(matmul_dtype)                      # (S, H)
        qkv = jnp.dot(x, wqkv_ref[...],
                      preferred_element_type=jnp.float32)        # (S, 3H)
        qkv = (qkv + bqkv_ref[...]).astype(matmul_dtype)         # head-major cols
        for i in range(num_heads):                               # static relayout
            qkv_vmem[i] = qkv[:, i * 3 * dh:(i + 1) * 3 * dh]    # (S, 3*dh)

    # ---- Phase 2 (every head): S x S attention for this head.
    qkv_h = qkv_vmem[h]                                          # (S, 3*dh)
    qh = qkv_h[:, 0 * dh:1 * dh]        # already pre-scaled by 1/sqrt(dh)
    kh = qkv_h[:, 1 * dh:2 * dh]
    vh = qkv_h[:, 2 * dh:3 * dh]

    # NT matmul: contract last dim of both operands (no explicit transpose).
    scores = lax.dot_general(qh, kh, (((1,), (1,)), ((), ())),
                             preferred_element_type=jnp.float32)  # (S, S)
    scores = scores + mask_ref[...]                               # (S,S)+(1,S)
    scores = scores - jnp.max(scores, axis=-1, keepdims=True)
    p = jnp.exp(scores)                                           # unnormalized
    denom = jnp.sum(p, axis=-1, keepdims=True)                    # (S, 1)
    ctx_h = jnp.dot(p.astype(matmul_dtype), vh,
                    preferred_element_type=jnp.float32)           # (S, dh)
    ctx_h = ctx_h * pl.reciprocal(denom, approx=True)             # deferred norm
    ctx_vmem[h] = ctx_h.astype(matmul_dtype)

    # ---- Phase 3 (last head): fused output projection + residual + LayerNorm.
    @pl.when(h == num_heads - 1)
    def _():
        ctx = jnp.concatenate([ctx_vmem[i] for i in range(num_heads)],
                              axis=-1)                            # (S, H)
        y = jnp.dot(ctx, wo_ref[...],
                    preferred_element_type=jnp.float32) + bo_ref[...]
        t = y + x_ref[...]
        mean = jnp.mean(t, axis=-1, keepdims=True)
        tc = t - mean
        var = jnp.mean(tc * tc, axis=-1, keepdims=True)
        out_ref[...] = (tc * lax.rsqrt(var + 1e-12) * gamma_ref[...]
                        + beta_ref[...]).astype(out_ref.dtype)


def prepare_params(params, *, num_heads, matmul_dtype=jnp.bfloat16):
    """One-time (init-time) weight re-layout: head-major QKV columns, scale
    folded into Wq/bq, matmul weights cast to bf16. NOT in the per-call path."""
    H = params["wo"].shape[0]
    dh = H // num_heads
    scale = 1.0 / math.sqrt(dh)

    w = params["wqkv"].reshape(H, 3, num_heads, dh)
    w = w.at[:, 0, :, :].multiply(scale)                 # fold 1/sqrt(dh) into Wq
    w = jnp.transpose(w, (0, 2, 1, 3)).reshape(H, 3 * H)  # cols = [h][q|k|v][dh]

    b = params["bqkv"].reshape(3, num_heads, dh)
    b = b.at[0].multiply(scale)                           # fold scale into bq
    b = jnp.transpose(b, (1, 0, 2)).reshape(1, 3 * H)

    return {
        "wqkv_hm": w.astype(matmul_dtype),
        "bqkv_hm": b.astype(jnp.float32),
        "wo": params["wo"].astype(matmul_dtype),           # (H, H)
        "bo": params["bo"].reshape(1, H).astype(jnp.float32),
        "gamma": params["gamma"].reshape(1, H).astype(jnp.float32),
        "beta": params["beta"].reshape(1, H).astype(jnp.float32),
    }


def bert_attention(x, mask, prep, *, num_heads):
    B, S, H = x.shape
    dh = H // num_heads
    mm_dtype = prep["wqkv_hm"].dtype

    kernel = functools.partial(
        bert_attention_kernel, num_heads=num_heads, head_dim=dh,
        matmul_dtype=mm_dtype)

    wfull = lambda b, h: (0, 0)   # whole-array weight blocks, grid-resident

    flops = B * (2 * S * H * (3 * H) + 4 * S * S * H + 2 * S * H * H)
    transcendentals = B * (num_heads * S * S + S)
    bytes_accessed = (4 * (2 * B * S * H + B * S)          # x, out, mask (f32)
                      + 2 * (H * 3 * H + H * H)             # bf16 weights
                      + 4 * (3 * H + 3 * H))                # f32 biases / LN
    cost = pl.CostEstimate(flops=flops, transcendentals=transcendentals,
                           bytes_accessed=bytes_accessed)

    return pl.pallas_call(
        kernel,
        out_shape=jax.ShapeDtypeStruct((B, S, H), jnp.float32),
        grid_spec=pltpu.PrefetchScalarGridSpec(
            num_scalar_prefetch=0,
            grid=(B, num_heads),
            in_specs=[
                pl.BlockSpec((None, S, H), lambda b, h: (b, 0, 0)),   # x
                pl.BlockSpec((None, 1, S), lambda b, h: (b, 0, 0)),   # mask
                pl.BlockSpec((H, 3 * H), wfull),                      # Wqkv (hm)
                pl.BlockSpec((1, 3 * H), wfull),                      # bqkv (hm)
                pl.BlockSpec((H, H), wfull),                          # Wo
                pl.BlockSpec((1, H), wfull),                          # bo
                pl.BlockSpec((1, H), wfull),                          # gamma
                pl.BlockSpec((1, H), wfull),                          # beta
            ],
            out_specs=pl.BlockSpec((None, S, H), lambda b, h: (b, 0, 0)),
            scratch_shapes=[
                pltpu.VMEM((num_heads, S, 3 * dh), mm_dtype),  # head-major qkv
                pltpu.VMEM((num_heads, S, dh), mm_dtype),      # head-major ctx
            ],
        ),
        compiler_params=pltpu.CompilerParams(
            dimension_semantics=("parallel", "arbitrary"),
        ),
        cost_estimate=cost,
    )(x, mask, prep["wqkv_hm"], prep["bqkv_hm"], prep["wo"], prep["bo"],
      prep["gamma"], prep["beta"])


def bert_attention_ref(x, mask, params, *, num_heads):
    """Pure-JAX f32 reference mirroring PyTorch BertAttention (dropout = id)."""
    B, S, H = x.shape
    dh = H // num_heads
    qkv = x @ params["wqkv"] + params["bqkv"]
    q, k, v = jnp.split(qkv, 3, axis=-1)

    def heads(t):  # (B,S,H) -> (B,nH,S,dh)
        return t.reshape(B, S, num_heads, dh).transpose(0, 2, 1, 3)

    qh, kh, vh = heads(q), heads(k), heads(v)
    scores = jnp.einsum("bhqd,bhkd->bhqk", qh, kh) / math.sqrt(dh)
    scores = scores + mask[:, None, :, :]
    probs = jax.nn.softmax(scores, axis=-1)
    ctx = jnp.einsum("bhqk,bhkd->bhqd", probs, vh)
    ctx = ctx.transpose(0, 2, 1, 3).reshape(B, S, H)

    y = ctx @ params["wo"] + params["bo"]
    t = y + x
    mu = jnp.mean(t, axis=-1, keepdims=True)
    var = jnp.mean((t - mu) ** 2, axis=-1, keepdims=True)
    return (t - mu) * lax.rsqrt(var + 1e-12) * params["gamma"] + params["beta"]


if __name__ == "__main__":
    # Small BERT config: hidden=128, heads=4 (head_dim=32), batch=2, seq=128.
    B, S, H, NH = 2, 128, 128, 4

    key = jax.random.PRNGKey(0)
    ks = jax.random.split(key, 8)
    scale = 0.02

    params = {
        # nn.Linear stores (out, in); pre-transposed to (in, out) so the kernel
        # computes x @ W + b directly.
        "wqkv": scale * jax.random.normal(ks[0], (H, 3 * H), jnp.float32),
        "bqkv": scale * jax.random.normal(ks[1], (3 * H,), jnp.float32),
        "wo":   scale * jax.random.normal(ks[2], (H, H), jnp.float32),
        "bo":   scale * jax.random.normal(ks[3], (H,), jnp.float32),
        "gamma": jnp.ones((H,), jnp.float32),
        "beta":  jnp.zeros((H,), jnp.float32),
    }

    x = jax.random.normal(ks[4], (B, S, H), jnp.float32)

    # Additive attention mask: first `valid` positions visible, rest -1e4.
    valid = jnp.array([S, S // 2], jnp.int32)
    pos = jnp.arange(S)[None, :]
    mask = jnp.where(pos < valid[:, None], 0.0, -10000.0).astype(jnp.float32)
    mask = mask.reshape(B, 1, S)   # broadcasts over (heads, query) like (B,1,1,S)

    # One-time weight re-layout (init-time, not in the forward path).
    prep = prepare_params(params, num_heads=NH)

    out = bert_attention(x, mask, prep, num_heads=NH)
    out = jax.block_until_ready(out)

    ref = bert_attention_ref(x, mask, params, num_heads=NH)
    assert out.shape == (B, S, H)
    # Tolerance covers bf16 MXU operands + pl.reciprocal(approx=True).
    assert jnp.allclose(out, ref, atol=2e-2, rtol=2e-2), (
        float(jnp.max(jnp.abs(out - ref)))
    )

    print("KERNEL_OK")
</pallas_src>

<mosaic_0001>
module attributes {stable_mosaic.version = 11 : i64} {
  func.func @bert_attention_kernel(%arg0: i32, %arg1: i32, %arg2: memref<1x128x128xf32, #tpu.memory_space<vmem>>, %arg3: memref<1x1x128xf32, #tpu.memory_space<vmem>>, %arg4: memref<128x384xbf16, #tpu.memory_space<vmem>>, %arg5: memref<1x384xf32, #tpu.memory_space<vmem>>, %arg6: memref<128x128xbf16, #tpu.memory_space<vmem>>, %arg7: memref<1x128xf32, #tpu.memory_space<vmem>>, %arg8: memref<1x128xf32, #tpu.memory_space<vmem>>, %arg9: memref<1x128xf32, #tpu.memory_space<vmem>>, %arg10: memref<1x128x128xf32, #tpu.memory_space<vmem>>, %arg11: memref<4x128x96xbf16, #tpu.memory_space<vmem>>, %arg12: memref<4x128x32xbf16, #tpu.memory_space<vmem>>) attributes {dimension_semantics = [#tpu.dimension_semantics<parallel>, #tpu.dimension_semantics<arbitrary>], iteration_bounds = array<i64: 2, 4>, scalar_prefetch = 0 : i64, scratch_operands = 2 : i64, tpu.core_type = #tpu.core_type<tc>, window_params = [{transform_indices = @transform_0, window_bounds = array<i64: 1, 128, 128>}, {transform_indices = @transform_1, window_bounds = array<i64: 1, 1, 128>}, {pipeline_mode = #tpu.pipeline_mode<synchronous>, transform_indices = @transform_2, window_bounds = array<i64: 128, 384>}, {pipeline_mode = #tpu.pipeline_mode<synchronous>, transform_indices = @transform_3, window_bounds = array<i64: 1, 384>}, {pipeline_mode = #tpu.pipeline_mode<synchronous>, transform_indices = @transform_4, window_bounds = array<i64: 128, 128>}, {pipeline_mode = #tpu.pipeline_mode<synchronous>, transform_indices = @transform_5, window_bounds = array<i64: 1, 128>}, {pipeline_mode = #tpu.pipeline_mode<synchronous>, transform_indices = @transform_6, window_bounds = array<i64: 1, 128>}, {pipeline_mode = #tpu.pipeline_mode<synchronous>, transform_indices = @transform_7, window_bounds = array<i64: 1, 128>}, {transform_indices = @transform_8, window_bounds = array<i64: 1, 128, 128>}]} {
    %c0_i32 = arith.constant 0 : i32
    %0 = arith.cmpi eq, %arg1, %c0_i32 : i32
    %1 = arith.extui %0 : i1 to i32
    %c0_i32_0 = arith.constant 0 : i32
    %2 = arith.cmpi ne, %1, %c0_i32_0 : i32
    scf.if %2 {
      %c0_11 = arith.constant 0 : index
      %c0_12 = arith.constant 0 : index
      %c0_13 = arith.constant 0 : index
      %34 = vector.load %arg2[%c0_11, %c0_12, %c0_13] : memref<1x128x128xf32, #tpu.memory_space<vmem>>, vector<1x128x128xf32>
      %35 = vector.shape_cast %34 : vector<1x128x128xf32> to vector<128x128xf32>
      %36 = arith.truncf %35 : vector<128x128xf32> to vector<128x128xbf16>
      %c0_14 = arith.constant 0 : index
      %c0_15 = arith.constant 0 : index
      %37 = vector.load %arg4[%c0_14, %c0_15] : memref<128x384xbf16, #tpu.memory_space<vmem>>, vector<128x384xbf16>
      %cst_16 = arith.constant dense<0.000000e+00> : vector<128x384xf32>
      %38 = tpu.matmul %36, %37, %cst_16 {dimension_numbers = #tpu.dot_dimension_numbers<[1], [0], [0], [1], [0, 0, 1, 1], [], []>} : vector<128x128xbf16>, vector<128x384xbf16>, vector<128x384xf32> -> vector<128x384xf32>
      %c0_17 = arith.constant 0 : index
      %c0_18 = arith.constant 0 : index
      %39 = vector.load %arg5[%c0_17, %c0_18] : memref<1x384xf32, #tpu.memory_space<vmem>>, vector<1x384xf32>
      %40 = vector.broadcast %39 : vector<1x384xf32> to vector<128x384xf32>
      %41 = arith.addf %38, %40 : vector<128x384xf32>
      %42 = arith.truncf %41 : vector<128x384xf32> to vector<128x384xbf16>
      %43 = vector.extract_strided_slice %42 {offsets = [0, 0], sizes = [128, 96], strides = [1, 1]} : vector<128x384xbf16> to vector<128x96xbf16>
      %c0_19 = arith.constant 0 : index
      %c0_20 = arith.constant 0 : index
      %c0_21 = arith.constant 0 : index
      %44 = vector.load %arg11[%c0_19, %c0_20, %c0_21] : memref<4x128x96xbf16, #tpu.memory_space<vmem>>, vector<1x128x96xbf16>
      %45 = vector.shape_cast %44 : vector<1x128x96xbf16> to vector<128x96xbf16>
      %46 = vector.shape_cast %43 : vector<128x96xbf16> to vector<1x128x96xbf16>
      tpu.vector_store %arg11[%c0_19, %c0_20, %c0_21], %46 {strides = array<i32>} : memref<4x128x96xbf16, #tpu.memory_space<vmem>>, vector<1x128x96xbf16>,
      %47 = vector.extract_strided_slice %42 {offsets = [0, 96], sizes = [128, 96], strides = [1, 1]} : vector<128x384xbf16> to vector<128x96xbf16>
      %c1 = arith.constant 1 : index
      %c0_22 = arith.constant 0 : index
      %c0_23 = arith.constant 0 : index
      %48 = vector.load %arg11[%c1, %c0_22, %c0_23] : memref<4x128x96xbf16, #tpu.memory_space<vmem>>, vector<1x128x96xbf16>
      %49 = vector.shape_cast %48 : vector<1x128x96xbf16> to vector<128x96xbf16>
      %50 = vector.shape_cast %47 : vector<128x96xbf16> to vector<1x128x96xbf16>
      tpu.vector_store %arg11[%c1, %c0_22, %c0_23], %50 {strides = array<i32>} : memref<4x128x96xbf16, #tpu.memory_space<vmem>>, vector<1x128x96xbf16>,
      %51 = vector.extract_strided_slice %42 {offsets = [0, 192], sizes = [128, 96], strides = [1, 1]} : vector<128x384xbf16> to vector<128x96xbf16>
      %c2 = arith.constant 2 : index
      %c0_24 = arith.constant 0 : index
      %c0_25 = arith.constant 0 : index
      %52 = vector.load %arg11[%c2, %c0_24, %c0_25] : memref<4x128x96xbf16, #tpu.memory_space<vmem>>, vector<1x128x96xbf16>
      %53 = vector.shape_cast %52 : vector<1x128x96xbf16> to vector<128x96xbf16>
      %54 = vector.shape_cast %51 : vector<128x96xbf16> to vector<1x128x96xbf16>
      tpu.vector_store %arg11[%c2, %c0_24, %c0_25], %54 {strides = array<i32>} : memref<4x128x96xbf16, #tpu.memory_space<vmem>>, vector<1x128x96xbf16>,
      %55 = vector.extract_strided_slice %42 {offsets = [0, 288], sizes = [128, 96], strides = [1, 1]} : vector<128x384xbf16> to vector<128x96xbf16>
      %c3 = arith.constant 3 : index
      %c0_26 = arith.constant 0 : index
      %c0_27 = arith.constant 0 : index
      %56 = vector.load %arg11[%c3, %c0_26, %c0_27] : memref<4x128x96xbf16, #tpu.memory_space<vmem>>, vector<1x128x96xbf16>
      %57 = vector.shape_cast %56 : vector<1x128x96xbf16> to vector<128x96xbf16>
      %58 = vector.shape_cast %55 : vector<128x96xbf16> to vector<1x128x96xbf16>
      tpu.vector_store %arg11[%c3, %c0_26, %c0_27], %58 {strides = array<i32>} : memref<4x128x96xbf16, #tpu.memory_space<vmem>>, vector<1x128x96xbf16>,
    } else {
    }
    %3 = arith.index_cast %arg1 : i32 to index
    %c0 = arith.constant 0 : index
    %c0_1 = arith.constant 0 : index
    %4 = vector.load %arg11[%3, %c0, %c0_1] : memref<4x128x96xbf16, #tpu.memory_space<vmem>>, vector<1x128x96xbf16>
    %5 = vector.shape_cast %4 : vector<1x128x96xbf16> to vector<128x96xbf16>
    %6 = vector.extract_strided_slice %5 {offsets = [0, 0], sizes = [128, 32], strides = [1, 1]} : vector<128x96xbf16> to vector<128x32xbf16>
    %7 = vector.extract_strided_slice %5 {offsets = [0, 32], sizes = [128, 32], strides = [1, 1]} : vector<128x96xbf16> to vector<128x32xbf16>
    %8 = vector.extract_strided_slice %5 {offsets = [0, 64], sizes = [128, 32], strides = [1, 1]} : vector<128x96xbf16> to vector<128x32xbf16>
    %cst = arith.constant dense<0.000000e+00> : vector<128x128xf32>
    %9 = tpu.matmul %6, %7, %cst {dimension_numbers = #tpu.dot_dimension_numbers<[1], [1], [0], [0], [0, 0, 1, 0], [], []>} : vector<128x32xbf16>, vector<128x32xbf16>, vector<128x128xf32> -> vector<128x128xf32>
    %c0_2 = arith.constant 0 : index
    %c0_3 = arith.constant 0 : index
    %c0_4 = arith.constant 0 : index
    %10 = vector.load %arg3[%c0_2, %c0_3, %c0_4] : memref<1x1x128xf32, #tpu.memory_space<vmem>>, vector<1x1x128xf32>
    %11 = vector.shape_cast %10 : vector<1x1x128xf32> to vector<1x128xf32>
    %12 = vector.broadcast %11 : vector<1x128xf32> to vector<128x128xf32>
    %13 = arith.addf %9, %12 : vector<128x128xf32>
    %cst_5 = arith.constant dense<0xFF800000> : vector<128xf32>
    %14 = vector.multi_reduction <maximumf>, %13, %cst_5 [1] : vector<128x128xf32> to vector<128xf32>
    %15 = vector.shape_cast %14 : vector<128xf32> to vector<128x1xf32>
    %16 = vector.broadcast %15 : vector<128x1xf32> to vector<128x128xf32>
    %17 = arith.subf %13, %16 : vector<128x128xf32>
    %18 = math.exp %17 : vector<128x128xf32>
    %cst_6 = arith.constant dense<0.000000e+00> : vector<128xf32>
    %19 = vector.multi_reduction <add>, %18, %cst_6 [1] : vector<128x128xf32> to vector<128xf32>
    %20 = vector.shape_cast %19 : vector<128xf32> to vector<128x1xf32>
    %21 = arith.truncf %18 : vector<128x128xf32> to vector<128x128xbf16>
    %cst_7 = arith.constant dense<0.000000e+00> : vector<128x32xf32>
    %22 = tpu.matmul %21, %8, %cst_7 {dimension_numbers = #tpu.dot_dimension_numbers<[1], [0], [0], [1], [0, 0, 1, 1], [], []>} : vector<128x128xbf16>, vector<128x32xbf16>, vector<128x32xf32> -> vector<128x32xf32>
    %23 = tpu.reciprocal %20 {approx = true} : vector<128x1xf32> -> vector<128x1xf32>
    %24 = vector.broadcast %23 : vector<128x1xf32> to vector<128x32xf32>
    %25 = arith.mulf %22, %24 : vector<128x32xf32>
    %26 = arith.truncf %25 : vector<128x32xf32> to vector<128x32xbf16>
    %27 = arith.index_cast %arg1 : i32 to index
    %c0_8 = arith.constant 0 : index
    %c0_9 = arith.constant 0 : index
    %28 = vector.load %arg12[%27, %c0_8, %c0_9] : memref<4x128x32xbf16, #tpu.memory_space<vmem>>, vector<1x128x32xbf16>
    %29 = vector.shape_cast %28 : vector<1x128x32xbf16> to vector<128x32xbf16>
    %30 = vector.shape_cast %26 : vector<128x32xbf16> to vector<1x128x32xbf16>
    tpu.vector_store %arg12[%27, %c0_8, %c0_9], %30 {strides = array<i32>} : memref<4x128x32xbf16, #tpu.memory_space<vmem>>, vector<1x128x32xbf16>,
    %c3_i32 = arith.constant 3 : i32
    %31 = arith.cmpi eq, %arg1, %c3_i32 : i32
    %32 = arith.extui %31 : i1 to i32
    %c0_i32_10 = arith.constant 0 : i32
    %33 = arith.cmpi ne, %32, %c0_i32_10 : i32
    scf.if %33 {
      %c0_11 = arith.constant 0 : index
      %c0_12 = arith.constant 0 : index
      %c0_13 = arith.constant 0 : index
      %34 = vector.load %arg12[%c0_11, %c0_12, %c0_13] : memref<4x128x32xbf16, #tpu.memory_space<vmem>>, vector<1x128x32xbf16>
      %35 = vector.shape_cast %34 : vector<1x128x32xbf16> to vector<128x32xbf16>
      %c1 = arith.constant 1 : index
      %c0_14 = arith.constant 0 : index
      %c0_15 = arith.constant 0 : index
      %36 = vector.load %arg12[%c1, %c0_14, %c0_15] : memref<4x128x32xbf16, #tpu.memory_space<vmem>>, vector<1x128x32xbf16>
      %37 = vector.shape_cast %36 : vector<1x128x32xbf16> to vector<128x32xbf16>
      %c2 = arith.constant 2 : index
      %c0_16 = arith.constant 0 : index
      %c0_17 = arith.constant 0 : index
      %38 = vector.load %arg12[%c2, %c0_16, %c0_17] : memref<4x128x32xbf16, #tpu.memory_space<vmem>>, vector<1x128x32xbf16>
      %39 = vector.shape_cast %38 : vector<1x128x32xbf16> to vector<128x32xbf16>
      %c3 = arith.constant 3 : index
      %c0_18 = arith.constant 0 : index
      %c0_19 = arith.constant 0 : index
      %40 = vector.load %arg12[%c3, %c0_18, %c0_19] : memref<4x128x32xbf16, #tpu.memory_space<vmem>>, vector<1x128x32xbf16>
      %41 = vector.shape_cast %40 : vector<1x128x32xbf16> to vector<128x32xbf16>
      %42 = tpu.concatenate %35, %37, %39, %41 in 1 : vector<128x32xbf16>, vector<128x32xbf16>, vector<128x32xbf16>, vector<128x32xbf16> -> vector<128x128xbf16>
      %c0_20 = arith.constant 0 : index
      %c0_21 = arith.constant 0 : index
      %43 = vector.load %arg6[%c0_20, %c0_21] : memref<128x128xbf16, #tpu.memory_space<vmem>>, vector<128x128xbf16>
      %cst_22 = arith.constant dense<0.000000e+00> : vector<128x128xf32>
      %44 = tpu.matmul %42, %43, %cst_22 {dimension_numbers = #tpu.dot_dimension_numbers<[1], [0], [0], [1], [0, 0, 1, 1], [], []>} : vector<128x128xbf16>, vector<128x128xbf16>, vector<128x128xf32> -> vector<128x128xf32>
      %c0_23 = arith.constant 0 : index
      %c0_24 = arith.constant 0 : index
      %45 = vector.load %arg7[%c0_23, %c0_24] : memref<1x128xf32, #tpu.memory_space<vmem>>, vector<1x128xf32>
      %46 = vector.broadcast %45 : vector<1x128xf32> to vector<128x128xf32>
      %47 = arith.addf %44, %46 : vector<128x128xf32>
      %c0_25 = arith.constant 0 : index
      %c0_26 = arith.constant 0 : index
      %c0_27 = arith.constant 0 : index
      %48 = vector.load %arg2[%c0_25, %c0_26, %c0_27] : memref<1x128x128xf32, #tpu.memory_space<vmem>>, vector<1x128x128xf32>
      %49 = vector.shape_cast %48 : vector<1x128x128xf32> to vector<128x128xf32>
      %50 = arith.addf %47, %49 : vector<128x128xf32>
      %cst_28 = arith.constant dense<0.000000e+00> : vector<128xf32>
      %51 = vector.multi_reduction <add>, %50, %cst_28 [1] : vector<128x128xf32> to vector<128xf32>
      %52 = vector.shape_cast %51 : vector<128xf32> to vector<128x1xf32>
      %cst_29 = arith.constant 1.280000e+02 : f32
      %53 = vector.broadcast %cst_29 : f32 to vector<128x1xf32>
      %54 = arith.divf %52, %53 : vector<128x1xf32>
      %55 = vector.broadcast %54 : vector<128x1xf32> to vector<128x128xf32>
      %56 = arith.subf %50, %55 : vector<128x128xf32>
      %57 = arith.mulf %56, %56 : vector<128x128xf32>
      %cst_30 = arith.constant dense<0.000000e+00> : vector<128xf32>
      %58 = vector.multi_reduction <add>, %57, %cst_30 [1] : vector<128x128xf32> to vector<128xf32>
      %59 = vector.shape_cast %58 : vector<128xf32> to vector<128x1xf32>
      %cst_31 = arith.constant 1.280000e+02 : f32
      %60 = vector.broadcast %cst_31 : f32 to vector<128x1xf32>
      %61 = arith.divf %59, %60 : vector<128x1xf32>
      %cst_32 = arith.constant 9.99999996E-13 : f32
      %62 = vector.broadcast %cst_32 : f32 to vector<128x1xf32>
      %63 = arith.addf %61, %62 : vector<128x1xf32>
      %64 = math.rsqrt %63 : vector<128x1xf32>
      %65 = vector.broadcast %64 : vector<128x1xf32> to vector<128x128xf32>
      %66 = arith.mulf %56, %65 : vector<128x128xf32>
      %c0_33 = arith.constant 0 : index
      %c0_34 = arith.constant 0 : index
      %67 = vector.load %arg8[%c0_33, %c0_34] : memref<1x128xf32, #tpu.memory_space<vmem>>, vector<1x128xf32>
      %68 = vector.broadcast %67 : vector<1x128xf32> to vector<128x128xf32>
      %69 = arith.mulf %66, %68 : vector<128x128xf32>
      %c0_35 = arith.constant 0 : index
      %c0_36 = arith.constant 0 : index
      %70 = vector.load %arg9[%c0_35, %c0_36] : memref<1x128xf32, #tpu.memory_space<vmem>>, vector<1x128xf32>
      %71 = vector.broadcast %70 : vector<1x128xf32> to vector<128x128xf32>
      %72 = arith.addf %69, %71 : vector<128x128xf32>
      %c0_37 = arith.constant 0 : index
      %c0_38 = arith.constant 0 : index
      %c0_39 = arith.constant 0 : index
      %73 = vector.load %arg10[%c0_37, %c0_38, %c0_39] : memref<1x128x128xf32, #tpu.memory_space<vmem>>, vector<1x128x128xf32>
      %74 = vector.shape_cast %73 : vector<1x128x128xf32> to vector<128x128xf32>
      %75 = vector.shape_cast %72 : vector<128x128xf32> to vector<1x128x128xf32>
      tpu.vector_store %arg10[%c0_37, %c0_38, %c0_39], %75 {strides = array<i32>} : memref<1x128x128xf32, #tpu.memory_space<vmem>>, vector<1x128x128xf32>,
    } else {
    }
    return
  }
  func.func @transform_0(%arg0: i32, %arg1: i32) -> (i32, i32, i32) {
    %c0_i32 = arith.constant 0 : i32
    %c0_i32_0 = arith.constant 0 : i32
    %c0_i32_1 = arith.constant 0 : i32
    return %arg0, %c0_i32, %c0_i32_0 : i32, i32, i32
  }
  func.func @transform_1(%arg0: i32, %arg1: i32) -> (i32, i32, i32) {
    %c0_i32 = arith.constant 0 : i32
    %c0_i32_0 = arith.constant 0 : i32
    %c0_i32_1 = arith.constant 0 : i32
    return %arg0, %c0_i32, %c0_i32_0 : i32, i32, i32
  }
  func.func @transform_2(%arg0: i32, %arg1: i32) -> (i32, i32) {
    %c0_i32 = arith.constant 0 : i32
    %c0_i32_0 = arith.constant 0 : i32
    %c0_i32_1 = arith.constant 0 : i32
    return %c0_i32, %c0_i32_0 : i32, i32
  }
  func.func @transform_3(%arg0: i32, %arg1: i32) -> (i32, i32) {
    %c0_i32 = arith.constant 0 : i32
    %c0_i32_0 = arith.constant 0 : i32
    %c0_i32_1 = arith.constant 0 : i32
    return %c0_i32, %c0_i32_0 : i32, i32
  }
  func.func @transform_4(%arg0: i32, %arg1: i32) -> (i32, i32) {
    %c0_i32 = arith.constant 0 : i32
    %c0_i32_0 = arith.constant 0 : i32
    %c0_i32_1 = arith.constant 0 : i32
    return %c0_i32, %c0_i32_0 : i32, i32
  }
  func.func @transform_5(%arg0: i32, %arg1: i32) -> (i32, i32) {
    %c0_i32 = arith.constant 0 : i32
    %c0_i32_0 = arith.constant 0 : i32
    %c0_i32_1 = arith.constant 0 : i32
    return %c0_i32, %c0_i32_0 : i32, i32
  }
  func.func @transform_6(%arg0: i32, %arg1: i32) -> (i32, i32) {
    %c0_i32 = arith.constant 0 : i32
    %c0_i32_0 = arith.constant 0 : i32
    %c0_i32_1 = arith.constant 0 : i32
    return %c0_i32, %c0_i32_0 : i32, i32
  }
  func.func @transform_7(%arg0: i32, %arg1: i32) -> (i32, i32) {
    %c0_i32 = arith.constant 0 : i32
    %c0_i32_0 = arith.constant 0 : i32
    %c0_i32_1 = arith.constant 0 : i32
    return %c0_i32, %c0_i32_0 : i32, i32
  }
  func.func @transform_8(%arg0: i32, %arg1: i32) -> (i32, i32, i32) {
    %c0_i32 = arith.constant 0 : i32
    %c0_i32_0 = arith.constant 0 : i32
    %c0_i32_1 = arith.constant 0 : i32
    return %arg0, %c0_i32, %c0_i32_0 : i32, i32, i32
  }
}

</mosaic_0001>

<bundles_post_ra>
// kernel: tpu_custom_call.1
= control target key start
LH: loop header
LB: loop body
LE: loop exit
PB: predicated region body
PF: predicated region fallthrough
CT: control target
= control target key end

     0   :  { %s3885_s0 = inlined_call_operand.hbm [shape: f32[2,128,128], index: 0, kind: input, shape index: {}]   ;;  %s3886_s1 = inlined_call_operand.vmem [shape: f32[2,1,128], index: 1, kind: input, shape index: {}]   ;;  %s3887_s2 = inlined_call_operand.hbm [shape: bf16[128,384], index: 2, kind: input, shape index: {}]   ;;  %s3888_s3 = inlined_call_operand.vmem [shape: f32[1,384], index: 3, kind: input, shape index: {}]   ;;  %s3889_s4 = inlined_call_operand.hbm [shape: bf16[128,128], index: 4, kind: input, shape index: {}]   ;;  %s3890_s5 = inlined_call_operand.vmem [shape: f32[1,128], index: 5, kind: input, shape index: {}]   ;;  %s3891_s6 = inlined_call_operand.vmem [shape: f32[1,128], index: 6, kind: input, shape index: {}]   ;;  %s3892_s7 = inlined_call_operand.vmem [shape: f32[1,128], index: 7, kind: input, shape index: {}]   ;;  %s3893_s8 = inlined_call_operand.hbm [shape: f32[2,128,128], index: 8, kind: output, shape index: {}]  }
   0x1   :  { %3901 = sst [smem:[#allocation16_spill]] %s3887_s2 }
   0x2   :  { %3902 = sst [smem:[#allocation17_spill]] %s3891_s6 }
   0x3   :  { %3903 = sst [smem:[#allocation18_spill]] %s3892_s7 }
   0x4   :  { %3904 = sst [smem:[#allocation19_spill]] %s3893_s8 }
   0x5   :  { %13 = vsyncpa [#allocation5], 0 }
   0x6   :  { %15 = vsyncpa [#allocation5 + $0x1], 0 }
   0x7   :  { %16 = vsyncpa [#allocation8], 0 }
   0x8   :  { %17 = vsyncpa [#allocation6], 0 }
   0x9   :  { %19 = vsyncpa [#allocation6 + $0x1], 0  ;;  %s3022_s27 = smov 0   ;;  %s3024_s28 = smov 0  }
   0xa   :  { %s3026_s29 = smov 0   ;;  %s3028_s30 = smov 0  }
   0xb   :  { %s3030_s9 = smov 0   ;;  %s3032_s10 = smov 0  }
   0xc   :  { %s3034_s11 = smov 0   ;;  %s3036_s12 = smov 0  }
   0xd LB: > { %3905 = sst [smem:[#allocation14_spill]] %s2926_s27  ;;  %s2226_s13 = sadd.s32 4294967295, %s2954_s12   ;;  %s2954_s12 = sphi %s3036_s12, %s25_s12   ;;  %s2950_s11 = sphi %s3034_s11, %s3934_s11   ;;  %s2946_s10 = sphi %s3032_s10, %s3933_s10   ;;  %s2942_s9 = sphi %s3030_s9, %s3932_s9   ;;  %s2938_s30 = sphi %s3028_s30, %s3931_s30   ;;  %s2934_s29 = sphi %s3026_s29, %s3930_s29   ;;  %s2930_s28 = sphi %s3024_s28, %s3929_s28   ;;  %s2926_s27 = sphi %s3022_s27, %s3928_s27  }
   0xe   : > { %s2227_s14 = sadd.s32 4294967294, %s2954_s12   ;;  %p57_p0 = scmp.ne.s32.totalorder %s2930_s28, %s2926_s27 }
   0xf   : > { %p3066_p1 = scmp.eq.s32.totalorder %s2226_s13, 0  ;;  %p3070_p2 = scmp.eq.s32.totalorder %s2226_s13, 7 }
  0x10   : > { %p239_p3 = scmp.eq.s32.totalorder %s2227_s14, 7  ;;  %p2228_p5 = scmp.ge.s32.totalorder %s2954_s12, 1 }
  0x11   : > { %s3906_s15 = scalar_select %p3066_p1, 1, 0 }
  0x12   : > { %s3907_s16 = scalar_select %p3070_p2, 1, 0 }
  0x13   : > { %p3076_p4 = por %p3066_p1, %p57_p0  ;;  %p3081_p6 = por %p239_p3, %p57_p0 }
  0x14   : > { %p246_p7 = scmp.lt.s32.totalorder %s2954_s12, 9  ;;  %s2956_s20 = smov [#allocation7]  }
  0x15   : > { %s3908_s17 = scalar_select %p3076_p4, 1, 0 }
  0x16   : > { %s3909_s18 = scalar_select %p3081_p6, 1, 0 }
  0x17   : > { %p3086_p8 = pnand %p2228_p5, %p246_p7  ;;  %s258_s21 = sshll.u32 %s2956_s20, 4  ;;  %s259_s21 = int_to_ptr.vmem [resolvable:$true] %s258_s21 }
  0x18   : > { %3910 = sst [smem:[#allocation15_spill]] %s3909_s18  ;;  %s2957_s23 = smov [#allocation9]  }
  0x19   : > { %s3911_s19 = scalar_select %p3086_p8, 1, 0 }
  0x1a   : > { %p2526_p9 = pneg %p3086_p8  ;;  %s274_s24 = sshll.u32 %s2957_s23, 4  ;;  %s3098_s24 = int_to_ptr.vmem [resolvable:$true] %s274_s24 }
  0x1b   : > { %s3913_s2 = sld [smem:[#allocation16_spill]] }
  0x1c   : > { %p3094_p10 = pnand %p2526_p9, %p3066_p1 }
  0x1e   : > { %p2768_p12 = pneg %p3094_p10 }
  0x21   : > { %s2766_s13 = scalar_lea.hbm %s3913_s2, 3072 }
  0x22   : > { %p2767_p11 = scmp.ne.s32.totalorder %s3913_s2, %s2766_s13  ;;  %p2773_p3 = scmp.lt.u32.totalorder %s2766_s13, %s3913_s2 }
  0x24   : > { %p2769_p13 = pnand %p2768_p12, %p2767_p11 }
  0x26   : > { %p2770_p0 = pneg %p2769_p13 }
  0x28   : > { %p2775_p5 = pnand %p2773_p3, %p2770_p0 }
  0x2a   : > { %2778 = shalt.err (!%p2775_p5)
}
  0x2b   : > { %s2779_s23 = scalar_lea.vmem %s259_s21, 3072  ;;  %p2787_p1 = scmp.lt.s32.totalorder %s259_s21, %s259_s21 }
  0x2c   : > { %p2780_p7 = scmp.ne.s32.totalorder %s259_s21, %s2779_s23  ;;  %p2788_p4 = scmp.lt.s32.totalorder %s2779_s23, %s2779_s23 }
  0x2e   : > { %p2782_p9 = pnand %p2780_p7, %p2768_p12  ;;  %p2789_p8 = por %p2788_p4, %p2787_p1 }
  0x30   : > { %p2783_p6 = pneg %p2782_p9 }
  0x32   : > { %p2790_p2 = pnand %p2789_p8, %p2783_p6 }
  0x34   : > { %2793 = shalt.err (!%p2790_p2)
}
  0x35   : > { %s2958_s25 = smov 192   ;;  %s2959_s26 = smov 12  }
  0x36   : > { %2529 = dma.hbm_to_vmem [thread:$0]  (!%p3094_p10), %s3913_s2, 3072, %s259_s21, [#allocation8], %s2958_s25, %s2958_s25, %s2959_s26  }
  0x37   : > { %s2794_s20 = scalar_lea.hbm %s3889_s4, 1024 }
  0x38   : > { %p2795_p11 = scmp.ne.s32.totalorder %s3889_s4, %s2794_s20  ;;  %p2801_p4 = scmp.lt.u32.totalorder %s2794_s20, %s3889_s4 }
  0x3a   : > { %p2797_p1 = pnand %p2795_p11, %p2768_p12 }
  0x3c   : > { %p2798_p2 = pneg %p2797_p1 }
  0x3e   : > { %p2803_p6 = pnand %p2801_p4, %p2798_p2 }
  0x40   : > { %2806 = shalt.err (!%p2803_p6)
}
  0x41   : > { %s2807_s21 = scalar_lea.vmem %s3098_s24, 1024  ;;  %p2815_p3 = scmp.lt.s32.totalorder %s3098_s24, %s3098_s24 }
  0x42   : > { %p2808_p8 = scmp.ne.s32.totalorder %s3098_s24, %s2807_s21  ;;  %p2816_p5 = scmp.lt.s32.totalorder %s2807_s21, %s2807_s21 }
  0x44   : > { %p2810_p13 = pnand %p2808_p8, %p2768_p12  ;;  %p2817_p7 = por %p2816_p5, %p2815_p3 }
  0x46   : > { %p2811_p0 = pneg %p2810_p13 }
  0x48   : > { %p2818_p9 = pnand %p2817_p7, %p2811_p0 }
  0x4a   : > { %2821 = shalt.err (!%p2818_p9)
}
  0x4b   : > { %s2960_s6 = smov 64   ;;  %s2961_s7 = smov 4  }
  0x4c   : > { %2532 = dma.hbm_to_vmem [thread:$0]  (!%p3094_p10), %s3889_s4, 1024, %s3098_s24, [#allocation8], %s2960_s6, %s2960_s6, %s2961_s7  }
  0x4d   : > { %s34_s26 = sadd.s32 1, %s2946_s10  ;;  %s37_s27 = sadd.s32 1, %s2950_s11 }
  0x4e   : > { %p35_p12 = scmp.ge.s32.totalorder %s34_s26, 4  ;;  %s44_s18 = sadd.s32 1, %s2934_s29 }
  0x4f   : > { %p51_p11 = scmp.ne.s32.totalorder %s2934_s29, %s2930_s28  ;;  %p52_p1 = scmp.eq.s32.totalorder %s2954_s12, 0 }
  0x50   : > { %s3936_s26 = smov (%p35_p12, %s34_s26), 0  ;;  %s3938_s27 = smov (!%p35_p12, %s37_s27), %s2950_s11 }
  0x51   : > { %p3156_p2 = por %p52_p1, %p51_p11  ;;  %p3915_p4 = scmp.ne.s32.totalorder %s3907_s16, 0 }
  0x52   : > { %p39_p10 = scmp.ge.s32.totalorder %s3938_s27, 2  ;;  %p2543_p8 = scmp.lt.s32.totalorder %s2954_s12, 8 }
  0x53   : > { %p3162_p6 = por %p3915_p4, %p51_p11  ;;  %s297_s24 = sand.u32 1, %s2934_s29  }
  0x54   : > { %s2294_s14 = sshll.u32 %s2950_s11, 11  ;;  %s3940_s27 = smov (%p39_p10, %s3938_s27), 0 }
  0x55   : > { %s2232_s20 = sshll.u32 %s297_s24, 7  ;;  %s41_s23 = ssub.s32 %s2950_s11, %s3940_s27 }
  0x56   : > { %p42_p13 = scmp.eq.s32.totalorder %s41_s23, 0  ;;  %s3176_s7 = scalar_lea.hbm %s3885_s0, %s2294_s14 }
  0x57   : > { %s301_s16 = scalar_lea.vmem [#allocation4], %s2232_s20  ;;  %p3180_p0 = pnand %p2543_p8, %p3156_p2 }
  0x58   : > { %s308_s8 = sshll.u32 %s301_s16, 4  ;;  %s3189_s23 = scalar_lea.sflag [#allocation5], %s297_s24  ;;  %s3187_s8 = int_to_ptr.vmem [resolvable:$true] %s308_s8 }
  0x59   : > { %s3185_s2 = scalar_select %p42_p13, %s2934_s29, %s44_s18  }
  0x5a   : > { %s2822_s14 = scalar_lea.hbm %s3176_s7, 2048  ;;  %p2824_p5 = pneg %p3180_p0 }
  0x5b   : > { %p2823_p3 = scmp.ne.s32.totalorder %s3176_s7, %s2822_s14  ;;  %s2827_s21 = scalar_lea.hbm %s3885_s0, 4096 }
  0x5c   : > { %p2828_p12 = scmp.lt.u32.totalorder %s3176_s7, %s3885_s0  ;;  %p2829_p11 = scmp.lt.u32.totalorder %s2827_s21, %s2822_s14 }
  0x5d   : > { %p2825_p7 = pnand %p2824_p5, %p2823_p3  ;;  %p2831_p2 = scmp.lt.u32.totalorder %s2822_s14, %s3176_s7 }
  0x5e   : > { %p2830_p1 = por %p2829_p11, %p2828_p12 }
  0x5f   : > { %p2826_p9 = pneg %p2825_p7 }
  0x60   : > { %p2832_p4 = por %p2831_p2, %p2830_p1 }
  0x62   : > { %p2833_p10 = pnand %p2832_p4, %p2826_p9 }
  0x64   : > { %2836 = shalt.err (!%p2833_p10)
}
  0x65   : > { %s2837_s18 = scalar_lea.vmem %s3187_s8, 2048  ;;  %s2962_s24 = smov [#allocation4]  }
  0x66   : > { %p2838_p8 = scmp.ne.s32.totalorder %s3187_s8, %s2837_s18  ;;  %s2842_s13 = sshll.u32 %s2962_s24, 4  ;;  %s2843_s13 = int_to_ptr.vmem [resolvable:$false] %s2842_s13 }
  0x67   : > { %s2844_s20 = scalar_lea.vmem %s2843_s13, 4096  ;;  %p2845_p7 = scmp.lt.s32.totalorder %s3187_s8, %s2843_s13 }
  0x68   : > { %p2840_p13 = pnand %p2838_p8, %p2824_p5  ;;  %p2846_p12 = scmp.lt.s32.totalorder %s2844_s20, %s2837_s18 }
  0x6a   : > { %p2841_p3 = pneg %p2840_p13  ;;  %p2847_p11 = por %p2846_p12, %p2845_p7 }
  0x6c   : > { %p2848_p1 = pnand %p2847_p11, %p2841_p3 }
  0x6e   : > { %2851 = shalt.err (!%p2848_p1)
}
  0x6f   : > { %s2963_s14 = smov 128   ;;  %s2964_s21 = smov 8  }
  0x70   : > { %2536 = dma.hbm_to_vmem [thread:$0]  (!%p3180_p0), %s3176_s7, 2048, %s3187_s8, %s3189_s23, %s2963_s14, %s2963_s14, %s2964_s21  }
  0x71   : > { %p3918_p5 = scmp.ne.s32.totalorder %s3911_s19, 0 }
  0x72   : > { %s3220_s6 = sand.u32 (!%p3918_p5), 1, %s2930_s28   ;;  %p3919_p9 = scmp.ne.s32.totalorder (!%p3918_p5), %s3908_s17, 0 }
  0x73   : > { %326 = sbr.rel (%p3918_p5) target bundleno = 2160 (0x870), region = 52  ;;  %s2236_s16 = sshll.u32 (!%p3918_p5), %s3220_s6, 7 }
  0x74   : > { %s329_s18 = scalar_lea.sflag (!%p3918_p5), [#allocation5], %s3220_s6  ;;  %s3224_s24 = scalar_lea.vmem (!%p3918_p5), [#allocation4], %s2236_s16 }
  0x7a   : > { %2913 = dma.done.wait (%p3919_p9), %s329_s18, 2048  }
  0x7b   : > { %2915 = vsyncadd (%p3919_p9), %s329_s18, 4294965248  ;;  %p3920_p0 = scmp.ne.s32.totalorder %s3906_s15, 0 }
  0x7d   : > { %2917 = dma.done.wait (%p3920_p0), [#allocation8], 4096  }
  0x7e   : > { %2919 = vsyncadd (%p3920_p0), [#allocation8], 4294963200  ;;  %p376_p2 = scmp.lt.s32.totalorder %s2942_s9, 1  ;;  %s3242_s23 = scalar_lea.vmem [#allocation10], %s2236_s16 }
  0x7f   : > { %p2240_p4 = scmp.ne.s32.totalorder %s2938_s30, 0 }
  0x80   : > { %s3236_s19 = scalar_select %p376_p2, %s2942_s9, 1 }
  0x81   : > { %383 = sbr.rel (%p2240_p4) target bundleno = 573 (0x23d), region = 68  ;;  %v2630_v0 = vld [vmem:[#allocation7 + $0x4] ss:$12 sps:$4 sm:$0xff] (!%p2240_p4)   ;;  %v2632_v1 = vld [vmem:[#allocation7 + $0x8] ss:$12 sps:$4 sm:$0xff] (!%p2240_p4)   ;;  %v2965_v2 = vmov (!%p2240_p4), 0   ;;  %v442_v49 = vlaneseq (!%p2240_p4) }
  0x82   : > { %s378_s25 = scalar_lea.vmem %s3886_s1, %s3236_s19  ;;  %617 = vmatprep.mubr.bf16.mxu0 (!%p2240_p4), %v2965_v2  ;;  %585 = vmatprep.subr.bf16.mxu0 (!%p2240_p4), %v2630_v0  ;;  %v2633_v3 = vld [vmem:[#allocation7] ss:$12 sps:$4 sm:$0xff] (!%p2240_p4)   ;;  %v2634_v4 = vld [vmem:[#allocation7 + $0x1c] ss:$12 sps:$4 sm:$0xff] (!%p2240_p4)   ;;  %v2637_v6 = vld [vmem:[#allocation7 + $0x18] ss:$12 sps:$4 sm:$0xff] (!%p2240_p4)  }
  0x83   : > { %2362 = vmatprep.subr.bf16.mxu1 (!%p2240_p4), %v2632_v1  ;;  %586 = vmatpush1.bf16.msra.mxu0 (!%p2240_p4), %v2633_v3  ;;  %v2636_v5 = vld [vmem:[#allocation7 + $0x20] ss:$12 sps:$4 sm:$0xff] (!%p2240_p4)   ;;  %v2640_v8 = vld [vmem:[#allocation7 + $0x38] ss:$12 sps:$4 sm:$0xff] (!%p2240_p4)   ;;  %v2641_v9 = vld [vmem:[#allocation7 + $0x30] ss:$12 sps:$4 sm:$0xff] (!%p2240_p4)  }
  0x84   : > { %2363 = vmatpush3.bf16.msra.mxu1 (!%p2240_p4), %v2632_v1  ;;  %587 = vmatprep.subr.bf16.mxu0 (!%p2240_p4), %v2634_v4  ;;  %v2638_v7 = vld [vmem:[#allocation7 + $0x34] ss:$12 sps:$4 sm:$0xff] (!%p2240_p4)   ;;  %v2642_v10 = vld [vmem:[#allocation7 + $0x4c] ss:$12 sps:$4 sm:$0xff] (!%p2240_p4)   ;;  %v2644_v11 = vld [vmem:[#allocation7 + $0x50] ss:$12 sps:$4 sm:$0xff] (!%p2240_p4)  }
  0x85   : > { %2364 = vmatprep.subr.bf16.mxu1 (!%p2240_p4), %v2636_v5  ;;  %v2645_v12 = vld [vmem:[#allocation7 + $0x48] ss:$12 sps:$4 sm:$0xff] (!%p2240_p4)   ;;  %v2646_v13 = vld [vmem:[#allocation7 + $0x64] ss:$12 sps:$4 sm:$0xff] (!%p2240_p4)   ;;  %v2649_v15 = vld [vmem:[#allocation7 + $0x60] ss:$12 sps:$4 sm:$0xff] (!%p2240_p4)  }
  0x86   : > { %v2648_v14 = vld [vmem:[#allocation7 + $0x68] ss:$12 sps:$4 sm:$0xff] (!%p2240_p4)   ;;  %v2652_v17 = vld [vmem:[#allocation7 + $0x80] ss:$12 sps:$4 sm:$0xff] (!%p2240_p4)   ;;  %v2653_v20 = vld [vmem:[#allocation7 + $0x78] ss:$12 sps:$4 sm:$0xff] (!%p2240_p4)  }
  0x87   : > { %588 = vmatpush1.bf16.msra.mxu0 (!%p2240_p4), %v2637_v6  ;;  %v2650_v16 = vld [vmem:[#allocation7 + $0x7c] ss:$12 sps:$4 sm:$0xff] (!%p2240_p4)   ;;  %v384_v18 = vld [vmem:[%s3224_s24] sm:$0xff] (!%p2240_p4)  ;;  %v2658_v25 = vld [vmem:[#allocation7 + $0xac] ss:$12 sps:$4 sm:$0xff] (!%p2240_p4)   ;;  %v443_v50 = vshrl.u32 (!%p2240_p4), %v442_v49, 7 }
  0x88   : > { %2365 = vmatpush3.bf16.msra.mxu1 %v2636_v5  ;;  %589 = vmatprep.subr.bf16.mxu0 %v2638_v7  ;;  %v385_v19 = vld [vmem:[%s3224_s24 + $0x8] sm:$0xff]  ;;  %v2654_v22 = vld [vmem:[#allocation7 + $0x94] ss:$12 sps:$4 sm:$0xff]   ;;  %v2656_v23 = vld [vmem:[#allocation7 + $0x98] ss:$12 sps:$4 sm:$0xff]   ;;  %vm819_vm0 = vcmask 785408  }
  0x89   : > { %2366 = vmatprep.subr.bf16.mxu1 %v2640_v8  ;;  %v400_v21 = vpack.c.bf16 %v385_v19, %v384_v18  ;;  %v2657_v24 = vld [vmem:[#allocation7 + $0x90] ss:$12 sps:$4 sm:$0xff]   ;;  %v2661_v27 = vld [vmem:[#allocation7 + $0xa8] ss:$12 sps:$4 sm:$0xff]   ;;  %v388_v30 = vld [vmem:[%s3224_s24 + $0x20] sm:$0xff]  ;;  %v444_v51 = vsub.s32 0, %v443_v50 }
  0x8a   : > { %v2660_v26 = vld [vmem:[#allocation7 + $0xb0] ss:$12 sps:$4 sm:$0xff]   ;;  %v389_v31 = vld [vmem:[%s3224_s24 + $0x28] sm:$0xff]  ;;  %v392_v36 = vld [vmem:[%s3224_s24 + $0x40] sm:$0xff]  ;;  %v452_v52 = vsub.s32 2, %v443_v50  ;;  %v448_v54 = vsub.s32 1, %v443_v50 }
  0x8b   : > { %590 = vmatpush1.bf16.msra.mxu0 %v2641_v9  ;;  %2378 = vmatprep.mubr.bf16.mxu1 %v400_v21  ;;  %v386_v28 = vld [vmem:[%s3224_s24 + $0x10] sm:$0xff]  ;;  %v387_v29 = vld [vmem:[%s3224_s24 + $0x18] sm:$0xff]  ;;  %v402_v33 = vpack.c.bf16 %v389_v31, %v388_v30  ;;  %v393_v37 = vld [vmem:[%s3224_s24 + $0x48] sm:$0xff]  ;;  %s2966_s13 = smov 64   ;;  %s2967_s20 = smov 32   ;;  %vm876_vm1 = vcmask 261120  }
  0x8c   : > { %2367 = vmatpush3.bf16.msra.mxu1 %v2640_v8  ;;  %591 = vmatprep.subr.bf16.mxu0 %v2642_v10  ;;  %v401_v32 = vpack.c.bf16 %v387_v29, %v386_v28  ;;  %v390_v34 = vld [vmem:[%s3224_s24 + $0x30] sm:$0xff]  ;;  %v391_v35 = vld [vmem:[%s3224_s24 + $0x38] sm:$0xff]  ;;  %v404_v39 = vpack.c.bf16 %v393_v37, %v392_v36  ;;  %v396_v42 = vld [vmem:[%s3224_s24 + $0x60] sm:$0xff]  ;;  %s2968_s14 = smov 96   ;;  %vm942_vm2 = vcmask 523264  }
  0x8d   : > { %2368 = vmatprep.subr.bf16.mxu1 %v2644_v11  ;;  %v403_v38 = vpack.c.bf16 %v391_v35, %v390_v34  ;;  %v394_v40 = vld [vmem:[%s3224_s24 + $0x50] sm:$0xff]  ;;  %v395_v41 = vld [vmem:[%s3224_s24 + $0x58] sm:$0xff]  ;;  %v397_v43 = vld [vmem:[%s3224_s24 + $0x68] sm:$0xff] }
  0x8e   : > { %v405_v44 = vpack.c.bf16 %v395_v41, %v394_v40  ;;  %v406_v45 = vpack.c.bf16 %v397_v43, %v396_v42  ;;  %v398_v46 = vld [vmem:[%s3224_s24 + $0x70] sm:$0xff]  ;;  %v399_v47 = vld [vmem:[%s3224_s24 + $0x78] sm:$0xff]  ;;  %v440_v53 = vld [vmem:[%s3888_s3] sm:$0x7] }
  0x8f   : > { %592 = vmatpush1.bf16.msra.mxu0 %v2645_v12  ;;  %v407_v48 = vpack.c.bf16 %v399_v47, %v398_v46  ;;  %v3272_v55 = vrot.slane %v440_v53, %v444_v51  ;;  %v3274_v56 = vrot.slane %v440_v53, %v452_v52  ;;  %v3276_v59 = vrot.slane %v440_v53, %v448_v54 }
  0x90   : > { %2369 = vmatpush3.bf16.msra.mxu1 %v2644_v11  ;;  %593 = vmatprep.subr.bf16.mxu0 %v2646_v13 }
  0x91   : > { %2370 = vmatprep.subr.bf16.mxu1 %v2648_v14 }
  0x93   : > { %594 = vmatpush1.bf16.msra.mxu0 %v2649_v15 }
  0x94   : > { %2371 = vmatpush3.bf16.msra.mxu1 %v2648_v14  ;;  %595 = vmatprep.subr.bf16.mxu0 %v2650_v16 }
  0x95   : > { %2372 = vmatprep.subr.bf16.mxu1 %v2652_v17 }
  0x97   : > { %596 = vmatpush1.bf16.msra.mxu0 %v2653_v20 }
  0x98   : > { %2373 = vmatpush3.bf16.msra.mxu1 %v2652_v17  ;;  %597 = vmatprep.subr.bf16.mxu0 %v2654_v22 }
  0x99   : > { %2374 = vmatprep.subr.bf16.mxu1 %v2656_v23 }
  0x9b   : > { %598 = vmatpush1.bf16.msra.mxu0 %v2657_v24 }
  0x9c   : > { %2375 = vmatpush3.bf16.msra.mxu1 %v2656_v23  ;;  %599 = vmatprep.subr.bf16.mxu0 %v2658_v25 }
  0x9d   : > { %2376 = vmatprep.subr.bf16.mxu1 %v2660_v26 }
  0x9f   : > { %600 = vmatpush1.bf16.msra.mxu0 %v2661_v27 }
  0xa0   : > { %2377 = vmatpush3.bf16.msra.mxu1 %v2660_v26 }
  0xa2   : > { %618 = vmatmul.mubr.bf16.vlgmr.msra.gmra.mrb[0].mxu0 %v400_v21 }
  0xa3   : > { %2379 = vmatmul.mubr.bf16.vlgmr.msra.gmra.mrb[0].mxu1 %v401_v32  ;;  %627 = vmatprep.mubr.bf16.mxu0 %v2965_v2 }
  0xa4   : > { %2382 = vmatprep.mubr.bf16.mxu1 %v402_v33 }
  0xaa   : > { %628 = vmatmul.mubr.bf16.gmra.mrb[4].mxu0 %v401_v32 }
  0xab   : > { %2383 = vmatmul.mubr.bf16.gmra.mrb[4].mxu1 %v403_v38  ;;  %637 = vmatprep.mubr.bf16.mxu0 %v2965_v2 }
  0xac   : > { %2386 = vmatprep.mubr.bf16.mxu1 %v404_v39 }
  0xb2   : > { %638 = vmatmul.mubr.bf16.gmra.mrb[8].mxu0 %v402_v33 }
  0xb3   : > { %2387 = vmatmul.mubr.bf16.gmra.mrb[8].mxu1 %v405_v44  ;;  %647 = vmatprep.mubr.bf16.mxu0 %v2965_v2 }
  0xb4   : > { %2390 = vmatprep.mubr.bf16.mxu1 %v406_v45 }
  0xba   : > { %648 = vmatmul.mubr.bf16.gmra.mrb[12].mxu0 %v403_v38 }
  0xbb   : > { %2391 = vmatmul.mubr.bf16.gmra.mrb[12].mxu1 %v407_v48  ;;  %657 = vmatprep.mubr.bf16.mxu0 %v2965_v2 }
  0xc2   : > { %658 = vmatmul.mubr.bf16.gmra.mrb[16].mxu0 %v404_v39 }
  0xc3   : > { %667 = vmatprep.mubr.bf16.mxu0 %v2965_v2 }
  0xca   : > { %668 = vmatmul.mubr.bf16.gmra.mrb[20].mxu0 %v405_v44 }
  0xcb   : > { %677 = vmatprep.mubr.bf16.mxu0 %v2965_v2 }
  0xd2   : > { %678 = vmatmul.mubr.bf16.gmra.mrb[24].mxu0 %v406_v45 }
  0xd3   : > { %687 = vmatprep.mubr.bf16.mxu0 %v2965_v2 }
  0xda   : > { %688 = vmatmul.mubr.bf16.gmra.mrb[28].mxu0 %v407_v48 }
 0x175   : > { %v619_v57 = vpop.f32.mrb[0].mxu0 }
 0x176   : > { %v2380_v58 = vpop.f32.mrb[0].mxu1  ;;  %v621_v60 = vpop.f32.mrb[1].mxu0  ;;  %v620_v0 = vadd.f32 %v619_v57, %v3272_v55 }
 0x177   : > { %v732_v61 = vpop.f32.mrb[1].mxu1  ;;  %v623_v62 = vpop.f32.mrb[2].mxu0  ;;  %v741_v1 = vadd.f32 %v2380_v58, %v3274_v56  ;;  %v622_v6 = vadd.f32 %v621_v60, %v3276_v59 }
 0x178   : > { %v2381_v63 = vpop.f32.mrb[2].mxu1  ;;  %v624_v2 = vadd.f32 %v623_v62, %v3272_v55  ;;  %v625_v4 = vpop.f32.mrb[3].mxu0  ;;  %v733_v7 = vadd.f32 %v732_v61, %v3274_v56 }
 0x179   : > { %v744_v3 = vadd.f32 %v2381_v63, %v3274_v56  ;;  %v735_v5 = vpop.f32.mrb[3].mxu1  ;;  %v626_v8 = vadd.f32 %v625_v4, %v3276_v59 }
 0x17a   : > { %v736_v9 = vadd.f32 %v735_v5, %v3274_v56  ;;  %v795_v11 = vpack.c.bf16 %v624_v2, %v620_v0 }
 0x17b   : > { %v800_v10 = vpack.c.bf16 %v744_v3, %v741_v1  ;;  %v796_v12 = vpack.c.bf16 %v626_v8, %v622_v6 }
 0x17c   : > { %v797_v13 = vpack.c.bf16 %v736_v9, %v733_v7  ;;  %844 = vrot.lane.b32.xlu0 %v795_v11, %s2967_s20  ;;  %820 = vst.msk [vmem:[#allocation2] sm:$0xff] %vm819_vm0, %v795_v11 }
 0x17d   : > { %916 = vrot.lane.b32.xlu1 %v800_v10, %s2966_s13  ;;  %v629_v14 = vpop.f32.mrb[4].mxu0 }
 0x17e   : > { %v2384_v15 = vpop.f32.mrb[4].mxu1  ;;  %v630_v16 = vadd.f32 %v629_v14, %v3272_v55  ;;  %v631_v17 = vpop.f32.mrb[5].mxu0 }
 0x17f   : > { %v757_v18 = vadd.f32 %v2384_v15, %v3274_v56  ;;  %v748_v19 = vpop.f32.mrb[5].mxu1  ;;  %v632_v20 = vadd.f32 %v631_v17, %v3276_v59  ;;  %v633_v21 = vpop.f32.mrb[6].mxu0 }
 0x180   : > { %v749_v22 = vadd.f32 %v748_v19, %v3274_v56  ;;  %v2385_v23 = vpop.f32.mrb[6].mxu1  ;;  %v634_v24 = vadd.f32 %v633_v21, %v3272_v55  ;;  %846 = vrot.lane.b32.xlu0 %v796_v12, %s2967_s20  ;;  %v635_v25 = vpop.f32.mrb[7].mxu0 }
 0x181   : > { %970 = vrot.lane.b32.xlu1 %v800_v10, %s2968_s14  ;;  %v760_v26 = vadd.f32 %v2385_v23, %v3274_v56  ;;  %v751_v27 = vpop.f32.mrb[7].mxu1  ;;  %v636_v28 = vadd.f32 %v635_v25, %v3276_v59 }
 0x182   : > { %v752_v29 = vadd.f32 %v751_v27, %v3274_v56  ;;  %v798_v30 = vpack.c.bf16 %v634_v24, %v630_v16 }
 0x183   : > { %v806_v31 = vpack.c.bf16 %v760_v26, %v757_v18  ;;  %v799_v32 = vpack.c.bf16 %v636_v28, %v632_v20 }
 0x184   : > { %v803_v33 = vpack.c.bf16 %v752_v29, %v749_v22  ;;  %821 = vst.msk [vmem:[#allocation2 + $0x8] sm:$0xff] %vm819_vm0, %v798_v30  ;;  %910 = vrot.lane.b32.xlu0 %v796_v12, %s2966_s13 }
 0x185   : > { %912 = vrot.lane.b32.xlu1 %v797_v13, %s2966_s13  ;;  %v639_v34 = vpop.f32.mrb[8].mxu0 }
 0x186   : > { %v2388_v35 = vpop.f32.mrb[8].mxu1  ;;  %v640_v36 = vadd.f32 %v639_v34, %v3272_v55  ;;  %v641_v37 = vpop.f32.mrb[9].mxu0 }
 0x187   : > { %v773_v38 = vadd.f32 %v2388_v35, %v3274_v56  ;;  %v764_v39 = vpop.f32.mrb[9].mxu1  ;;  %v642_v40 = vadd.f32 %v641_v37, %v3276_v59  ;;  %v643_v41 = vpop.f32.mrb[10].mxu0 }
 0x188   : > { %v765_v42 = vadd.f32 %v764_v39, %v3274_v56  ;;  %v2389_v43 = vpop.f32.mrb[10].mxu1  ;;  %968 = vrot.lane.b32.xlu0 %v797_v13, %s2968_s14  ;;  %v644_v44 = vadd.f32 %v643_v41, %v3272_v55  ;;  %v645_v45 = vpop.f32.mrb[11].mxu0 }
 0x189   : > { %848 = vrot.lane.b32.xlu1 %v798_v30, %s2967_s20  ;;  %v776_v46 = vadd.f32 %v2389_v43, %v3274_v56  ;;  %v767_v47 = vpop.f32.mrb[11].mxu1  ;;  %v646_v48 = vadd.f32 %v645_v45, %v3276_v59 }
 0x18a   : > { %v768_v49 = vadd.f32 %v767_v47, %v3274_v56  ;;  %v801_v50 = vpack.c.bf16 %v644_v44, %v640_v36 }
 0x18b   : > { %v812_v51 = vpack.c.bf16 %v776_v46, %v773_v38  ;;  %v802_v52 = vpack.c.bf16 %v646_v48, %v642_v40 }
 0x18c   : > { %v3312_v53 = vpack.c.bf16 %v768_v49, %v765_v42  ;;  %822 = vst.msk [vmem:[#allocation2 + $0x10] sm:$0xff] %vm819_vm0, %v801_v50  ;;  %914 = vrot.lane.b32.xlu0 %v799_v32, %s2966_s13 }
 0x18d   : > { %924 = vrot.lane.b32.xlu1 %v806_v31, %s2966_s13  ;;  %v649_v54 = vpop.f32.mrb[12].mxu0 }
 0x18e   : > { %v2392_v57 = vpop.f32.mrb[12].mxu1  ;;  %v650_v58 = vadd.f32 %v649_v54, %v3272_v55  ;;  %v651_v60 = vpop.f32.mrb[13].mxu0 }
 0x18f   : > { %v789_v61 = vadd.f32 %v2392_v57, %v3274_v56  ;;  %v780_v62 = vpop.f32.mrb[13].mxu1  ;;  %v652_v63 = vadd.f32 %v651_v60, %v3276_v59  ;;  %v653_v0 = vpop.f32.mrb[14].mxu0 }
 0x190   : > { %v781_v1 = vadd.f32 %v780_v62, %v3274_v56  ;;  %v2393_v2 = vpop.f32.mrb[14].mxu1  ;;  %972 = vrot.lane.b32.xlu0 %v803_v33, %s2968_s14  ;;  %v654_v3 = vadd.f32 %v653_v0, %v3272_v55  ;;  %v655_v4 = vpop.f32.mrb[15].mxu0 }
 0x191   : > { %974 = vrot.lane.b32.xlu1 %v806_v31, %s2968_s14  ;;  %v792_v5 = vadd.f32 %v2393_v2, %v3274_v56  ;;  %v783_v6 = vpop.f32.mrb[15].mxu1  ;;  %v656_v7 = vadd.f32 %v655_v4, %v3276_v59 }
 0x192   : > { %v784_v8 = vadd.f32 %v783_v6, %v3274_v56  ;;  %v804_v9 = vpack.c.bf16 %v654_v3, %v650_v58 }
 0x193   : > { %v3327_v10 = vpack.c.bf16 %v792_v5, %v789_v61  ;;  %v805_v11 = vpack.c.bf16 %v656_v7, %v652_v63 }
 0x194   : > { %v3329_v12 = vpack.c.bf16 %v784_v8, %v781_v1  ;;  %852 = vrot.lane.b32.xlu0 %v801_v50, %s2967_s20  ;;  %823 = vst.msk [vmem:[#allocation2 + $0x18] sm:$0xff] %vm819_vm0, %v804_v9 }
 0x195   : > { %850 = vrot.lane.b32.xlu1 %v799_v32, %s2967_s20  ;;  %v659_v13 = vpop.f32.mrb[16].mxu0 }
 0x196   : > { %v660_v14 = vadd.f32 %v659_v13, %v3272_v55  ;;  %v661_v15 = vpop.f32.mrb[17].mxu0 }
 0x197   : > { %v662_v16 = vadd.f32 %v661_v15, %v3276_v59  ;;  %v663_v17 = vpop.f32.mrb[18].mxu0 }
 0x198   : > { %918 = vrot.lane.b32.xlu0 %v802_v52, %s2966_s13  ;;  %v664_v56 = vadd.f32 %v663_v17, %v3272_v55  ;;  %v665_v18 = vpop.f32.mrb[19].mxu0 }
 0x199   : > { %920 = vrot.lane.b32.xlu1 %v803_v33, %s2966_s13  ;;  %v666_v19 = vadd.f32 %v665_v18, %v3276_v59 }
 0x19a   : > { %v807_v20 = vpack.c.bf16 %v664_v56, %v660_v14 }
 0x19b   : > { %v808_v21 = vpack.c.bf16 %v666_v19, %v662_v16 }
 0x19c   : > { %976 = vrot.lane.b32.xlu0 %v3312_v53, %s2968_s14  ;;  %824 = vst.msk [vmem:[#allocation2 + $0x20] sm:$0xff] %vm819_vm0, %v807_v20 }
 0x19d   : > { %932 = vrot.lane.b32.xlu1 %v812_v51, %s2966_s13  ;;  %v669_v22 = vpop.f32.mrb[20].mxu0 }
 0x19e   : > { %v670_v23 = vadd.f32 %v669_v22, %v3272_v55  ;;  %v671_v24 = vpop.f32.mrb[21].mxu0 }
 0x19f   : > { %v672_v25 = vadd.f32 %v671_v24, %v3276_v59  ;;  %v673_v26 = vpop.f32.mrb[22].mxu0 }
 0x1a0   : > { %856 = vrot.lane.b32.xlu0 %v804_v9, %s2967_s20  ;;  %v674_v27 = vadd.f32 %v673_v26, %v3272_v55  ;;  %v675_v28 = vpop.f32.mrb[23].mxu0 }
 0x1a1   : > { %978 = vrot.lane.b32.xlu1 %v812_v51, %s2968_s14  ;;  %v676_v29 = vadd.f32 %v675_v28, %v3276_v59 }
 0x1a2   : > { %v810_v30 = vpack.c.bf16 %v674_v27, %v670_v23 }
 0x1a3   : > { %v811_v31 = vpack.c.bf16 %v676_v29, %v672_v25 }
 0x1a4   : > { %922 = vrot.lane.b32.xlu0 %v805_v11, %s2966_s13  ;;  %825 = vst.msk [vmem:[#allocation2 + $0x28] sm:$0xff] %vm819_vm0, %v810_v30 }
 0x1a5   : > { %854 = vrot.lane.b32.xlu1 %v802_v52, %s2967_s20  ;;  %v679_v32 = vpop.f32.mrb[24].mxu0 }
 0x1a6   : > { %v680_v33 = vadd.f32 %v679_v32, %v3272_v55  ;;  %v681_v34 = vpop.f32.mrb[25].mxu0 }
 0x1a7   : > { %v682_v35 = vadd.f32 %v681_v34, %v3276_v59  ;;  %v683_v36 = vpop.f32.mrb[26].mxu0 }
 0x1a8   : > { %860 = vrot.lane.b32.xlu0 %v807_v20, %s2967_s20  ;;  %v684_v37 = vadd.f32 %v683_v36, %v3272_v55  ;;  %v685_v38 = vpop.f32.mrb[27].mxu0 }
 0x1a9   : > { %928 = vrot.lane.b32.xlu1 %v3312_v53, %s2966_s13  ;;  %v686_v39 = vadd.f32 %v685_v38, %v3276_v59 }
 0x1aa   : > { %v813_v40 = vpack.c.bf16 %v684_v37, %v680_v33 }
 0x1ab   : > { %v814_v41 = vpack.c.bf16 %v686_v39, %v682_v35 }
 0x1ac   : > { %926 = vrot.lane.b32.xlu0 %v808_v21, %s2966_s13  ;;  %826 = vst.msk [vmem:[#allocation2 + $0x30] sm:$0xff] %vm819_vm0, %v813_v40 }
 0x1ad   : > { %940 = vrot.lane.b32.xlu1 %v3327_v10, %s2966_s13  ;;  %v689_v42 = vpop.f32.mrb[28].mxu0 }
 0x1ae   : > { %v690_v43 = vadd.f32 %v689_v42, %v3272_v55  ;;  %v691_v44 = vpop.f32.mrb[29].mxu0 }
 0x1af   : > { %v692_v45 = vadd.f32 %v691_v44, %v3276_v59  ;;  %v693_v46 = vpop.f32.mrb[30].mxu0 }
 0x1b0   : > { %864 = vrot.lane.b32.xlu0 %v810_v30, %s2967_s20  ;;  %v694_v47 = vadd.f32 %v693_v46, %v3272_v55  ;;  %v695_v48 = vpop.f32.mrb[31].mxu0 }
 0x1b1   : > { %858 = vrot.lane.b32.xlu1 %v805_v11, %s2967_s20  ;;  %v696_v49 = vadd.f32 %v695_v48, %v3276_v59 }
 0x1b2   : > { %v816_v50 = vpack.c.bf16 %v694_v47, %v690_v43 }
 0x1b3   : > { %v817_v51 = vpack.c.bf16 %v696_v49, %v692_v45 }
 0x1b4   : > { %930 = vrot.lane.b32.xlu0 %v811_v31, %s2966_s13  ;;  %827 = vst.msk [vmem:[#allocation2 + $0x38] sm:$0xff] %vm819_vm0, %v816_v50 }
 0x1b5   : > { %936 = vrot.lane.b32.xlu1 %v3329_v12, %s2966_s13 }
 0x1b8   : > { %868 = vrot.lane.b32.xlu0 %v813_v40, %s2967_s20 }
 0x1b9   : > { %862 = vrot.lane.b32.xlu1 %v808_v21, %s2967_s20 }
 0x1bc   : > { %934 = vrot.lane.b32.xlu0 %v814_v41, %s2966_s13 }
 0x1bd   : > { %866 = vrot.lane.b32.xlu1 %v811_v31, %s2967_s20 }
 0x1c0   : > { %872 = vrot.lane.b32.xlu0 %v816_v50, %s2967_s20 }
 0x1c1   : > { %870 = vrot.lane.b32.xlu1 %v814_v41, %s2967_s20 }
 0x1c4   : > { %938 = vrot.lane.b32.xlu0 %v817_v51, %s2966_s13 }
 0x1c5   : > { %874 = vrot.lane.b32.xlu1 %v817_v51, %s2967_s20 }
 0x1c8   : > { %980 = vrot.lane.b32.xlu0 %v3329_v12, %s2968_s14 }
 0x1c9   : > { %982 = vrot.lane.b32.xlu1 %v3327_v10, %s2968_s14 }
 0x1ee   : > { %v845_v59 = vpop.permute.xlu0 %844 }
 0x1ef   : > { %v917_v55 = vpop.permute.xlu1 %916 }
 0x1f2   : > { %v847_v53 = vpop.permute.xlu0 %846 }
 0x1f3   : > { %v971_v52 = vpop.permute.xlu1 %970  ;;  %v877_v54 = vsel %vm876_vm1, %v845_v59, %v847_v53 }
 0x1f4   : > { %994 = vst.msk [vmem:[#allocation2 + $0xc8] sm:$0xff] %vm819_vm0, %v971_v52  ;;  %894 = vst.msk [vmem:[#allocation2 + $0x40] sm:$0xff] %vm819_vm0, %v877_v54 }
 0x1f6   : > { %v911_v58 = vpop.permute.xlu0 %910 }
 0x1f7   : > { %v913_v57 = vpop.permute.xlu1 %912 }
 0x1f8   : > { %v943_v60 = vsel %vm942_vm2, %v911_v58, %v913_v57 }
 0x1f9   : > { %960 = vst.msk [vmem:[#allocation2 + $0x80] sm:$0xff] %vm819_vm0, %v943_v60 }
 0x1fa   : > { %v969_v62 = vpop.permute.xlu0 %968 }
 0x1fb   : > { %v849_v61 = vpop.permute.xlu1 %848  ;;  %993 = vst.msk [vmem:[#allocation2 + $0xc0] sm:$0xff] %vm819_vm0, %v969_v62 }
 0x1fe   : > { %v915_v0 = vpop.permute.xlu0 %914 }
 0x1ff   : > { %v925_v63 = vpop.permute.xlu1 %924  ;;  %v944_v1 = vsel %vm942_vm2, %v915_v0, %v917_v55 }
 0x200   : > { %961 = vst.msk [vmem:[#allocation2 + $0x88] sm:$0xff] %vm819_vm0, %v944_v1 }
 0x202   : > { %v973_v3 = vpop.permute.xlu0 %972 }
 0x203   : > { %v975_v2 = vpop.permute.xlu1 %974  ;;  %995 = vst.msk [vmem:[#allocation2 + $0xd0] sm:$0xff] %vm819_vm0, %v973_v3 }
 0x204   : > { %996 = vst.msk [vmem:[#allocation2 + $0xd8] sm:$0xff] %vm819_vm0, %v975_v2 }
 0x206   : > { %v853_v5 = vpop.permute.xlu0 %852 }
 0x207   : > { %v851_v4 = vpop.permute.xlu1 %850 }
 0x208   : > { %v878_v6 = vsel %vm876_vm1, %v849_v61, %v851_v4 }
 0x209   : > { %895 = vst.msk [vmem:[#allocation2 + $0x48] sm:$0xff] %vm819_vm0, %v878_v6 }
 0x20a   : > { %v919_v8 = vpop.permute.xlu0 %918 }
 0x20b   : > { %v921_v7 = vpop.permute.xlu1 %920 }
 0x20c   : > { %v945_v9 = vsel %vm942_vm2, %v919_v8, %v921_v7 }
 0x20d   : > { %962 = vst.msk [vmem:[#allocation2 + $0x90] sm:$0xff] %vm819_vm0, %v945_v9 }
 0x20e   : > { %v977_v11 = vpop.permute.xlu0 %976 }
 0x20f   : > { %v933_v10 = vpop.permute.xlu1 %932  ;;  %997 = vst.msk [vmem:[#allocation2 + $0xe0] sm:$0xff] %vm819_vm0, %v977_v11 }
 0x212   : > { %v857_v13 = vpop.permute.xlu0 %856 }
 0x213   : > { %v979_v12 = vpop.permute.xlu1 %978 }
 0x214   : > { %998 = vst.msk [vmem:[#allocation2 + $0xe8] sm:$0xff] %vm819_vm0, %v979_v12 }
 0x216   : > { %v923_v15 = vpop.permute.xlu0 %922 }
 0x217   : > { %v855_v14 = vpop.permute.xlu1 %854  ;;  %v946_v17 = vsel %vm942_vm2, %v923_v15, %v925_v63 }
 0x218   : > { %v879_v16 = vsel %vm876_vm1, %v853_v5, %v855_v14  ;;  %963 = vst.msk [vmem:[#allocation2 + $0x98] sm:$0xff] %vm819_vm0, %v946_v17 }
 0x219   : > { %896 = vst.msk [vmem:[#allocation2 + $0x50] sm:$0xff] %vm819_vm0, %v879_v16 }
 0x21a   : > { %v861_v18 = vpop.permute.xlu0 %860 }
 0x21b   : > { %v929_v56 = vpop.permute.xlu1 %928 }
 0x21e   : > { %v927_v20 = vpop.permute.xlu0 %926 }
 0x21f   : > { %v941_v19 = vpop.permute.xlu1 %940  ;;  %v947_v21 = vsel %vm942_vm2, %v927_v20, %v929_v56 }
 0x220   : > { %964 = vst.msk [vmem:[#allocation2 + $0xa0] sm:$0xff] %vm819_vm0, %v947_v21 }
 0x222   : > { %v865_v23 = vpop.permute.xlu0 %864 }
 0x223   : > { %v859_v22 = vpop.permute.xlu1 %858 }
 0x224   : > { %v880_v24 = vsel %vm876_vm1, %v857_v13, %v859_v22 }
 0x225   : > { %897 = vst.msk [vmem:[#allocation2 + $0x58] sm:$0xff] %vm819_vm0, %v880_v24 }
 0x226   : > { %v931_v26 = vpop.permute.xlu0 %930 }
 0x227   : > { %v937_v25 = vpop.permute.xlu1 %936  ;;  %v948_v27 = vsel %vm942_vm2, %v931_v26, %v933_v10 }
 0x228   : > { %965 = vst.msk [vmem:[#allocation2 + $0xa8] sm:$0xff] %vm819_vm0, %v948_v27 }
 0x22a   : > { %v869_v29 = vpop.permute.xlu0 %868 }
 0x22b   : > { %v863_v28 = vpop.permute.xlu1 %862 }
 0x22c   : > { %v881_v30 = vsel %vm876_vm1, %v861_v18, %v863_v28 }
 0x22d   : > { %898 = vst.msk [vmem:[#allocation2 + $0x60] sm:$0xff] %vm819_vm0, %v881_v30 }
 0x22e   : > { %v935_v32 = vpop.permute.xlu0 %934 }
 0x22f   : > { %v867_v31 = vpop.permute.xlu1 %866  ;;  %v949_v34 = vsel %vm942_vm2, %v935_v32, %v937_v25 }
 0x230   : > { %v882_v33 = vsel %vm876_vm1, %v865_v23, %v867_v31  ;;  %966 = vst.msk [vmem:[#allocation2 + $0xb0] sm:$0xff] %vm819_vm0, %v949_v34 }
 0x231   : > { %899 = vst.msk [vmem:[#allocation2 + $0x68] sm:$0xff] %vm819_vm0, %v882_v33 }
 0x232   : > { %v873_v36 = vpop.permute.xlu0 %872 }
 0x233   : > { %v871_v35 = vpop.permute.xlu1 %870 }
 0x234   : > { %v883_v37 = vsel %vm876_vm1, %v869_v29, %v871_v35 }
 0x235   : > { %900 = vst.msk [vmem:[#allocation2 + $0x70] sm:$0xff] %vm819_vm0, %v883_v37 }
 0x236   : > { %v939_v39 = vpop.permute.xlu0 %938 }
 0x237   : > { %v875_v38 = vpop.permute.xlu1 %874  ;;  %v950_v41 = vsel %vm942_vm2, %v939_v39, %v941_v19 }
 0x238   : > { %v884_v40 = vsel %vm876_vm1, %v873_v36, %v875_v38  ;;  %967 = vst.msk [vmem:[#allocation2 + $0xb8] sm:$0xff] %vm819_vm0, %v950_v41 }
 0x239   : > { %901 = vst.msk [vmem:[#allocation2 + $0x78] sm:$0xff] %vm819_vm0, %v884_v40 }
 0x23a   : > { %v981_v43 = vpop.permute.xlu0 %980 }
 0x23b   : > { %v983_v42 = vpop.permute.xlu1 %982  ;;  %999 = vst.msk [vmem:[#allocation2 + $0xf0] sm:$0xff] %vm819_vm0, %v981_v43 }
 0x23c   : > { %1000 = vst.msk [vmem:[#allocation2 + $0xf8] sm:$0xff] %vm819_vm0, %v983_v42 }
 0x23d PF: > { %s2295_s21 = sshll.u32 %s2938_s30, 6  ;;  %s2969_s18 = smov 96   ;;  %vm1043_vm3 = vcmask 261120   ;;  %v2267_v11 = vld [vmem:[%s378_s25] ss:$0 sm:$0xff] }
 0x23e   : > { %s1003_s16 = scalar_lea.vmem [#allocation2], %s2295_s21  ;;  %s2970_s7 = smov 64  }
 0x23f   : > { %s3518_s19 = scalar_lea.vmem [#allocation3], %s2295_s21  ;;  %p2277_p10 = scmp.ne.s32.totalorder %s2938_s30, 3 }
 0x240   : > { %s2971_s25 = smov (!%p2277_p10), 32   ;;  %s2972_s17 = smov (!%p2277_p10), 64   ;;  %vm1615_vm4 = vcmask (!%p2277_p10), 523264   ;;  %vm1632_vm5 = vcmask (!%p2277_p10), 785408  }
 0x241   : > { %s2973_s30 = smov (!%p2277_p10), 96   ;;  %s3921_s21 = sld [smem:[#allocation17_spill]] (!%p2277_p10) }
 0x243   : > { %v1004_v44 = vld [vmem:[%s1003_s16] sm:$0xff]  ;;  %v1006_v45 = vld [vmem:[%s1003_s16 + $0x10] sm:$0xff]  ;;  %v1005_v46 = vld [vmem:[%s1003_s16 + $0x8] sm:$0xff] }
 0x244   : > { %1027 = vrot.lane.b32.xlu0 %v1004_v44, %s2969_s18  ;;  %1031 = vrot.lane.b32.xlu1 %v1006_v45, %s2969_s18  ;;  %v1007_v47 = vld [vmem:[%s1003_s16 + $0x18] sm:$0xff]  ;;  %v1008_v48 = vld [vmem:[%s1003_s16 + $0x20] sm:$0xff] }
 0x245   : > { %2410 = vmatprep.mubr.msk.bf16.mxu0 %vm1043_vm3, %v1004_v44  ;;  %v1009_v49 = vld [vmem:[%s1003_s16 + $0x28] sm:$0xff]  ;;  %v3430_v50 = vld [vmem:[%s1003_s16 + $0x30] sm:$0xff]  ;;  %v3432_v51 = vld [vmem:[%s1003_s16 + $0x38] sm:$0xff] }
 0x248   : > { %1029 = vrot.lane.b32.xlu0 %v1005_v46, %s2969_s18  ;;  %1033 = vrot.lane.b32.xlu1 %v1007_v47, %s2969_s18 }
 0x24c   : > { %1035 = vrot.lane.b32.xlu0 %v1008_v48, %s2969_s18  ;;  %1037 = vrot.lane.b32.xlu1 %v1009_v49, %s2969_s18 }
 0x250   : > { %1039 = vrot.lane.b32.xlu0 %v3430_v50, %s2969_s18  ;;  %1041 = vrot.lane.b32.xlu1 %v3432_v51, %s2969_s18 }
 0x254   : > { %1311 = vrot.lane.b32.xlu1 %v1005_v46, %s2970_s7  ;;  %1309 = vrot.lane.b32.xlu0 %v1004_v44, %s2970_s7 }
 0x258   : > { %1315 = vrot.lane.b32.xlu1 %v1007_v47, %s2970_s7  ;;  %1313 = vrot.lane.b32.xlu0 %v1006_v45, %s2970_s7 }
 0x25c   : > { %1319 = vrot.lane.b32.xlu1 %v1009_v49, %s2970_s7  ;;  %1317 = vrot.lane.b32.xlu0 %v1008_v48, %s2970_s7 }
 0x2b6   : > { %v1028_v55 = vpop.permute.xlu0 %1027  ;;  %v1032_v54 = vpop.permute.xlu1 %1031 }
 0x2b7   : > { %2506 = vmatprep.subr.msk.bf16.mxu0 %vm1043_vm3, %v1028_v55  ;;  %v1069_v59 = vsel %vm1043_vm3, %v1028_v55, 0  ;;  %v1075_v57 = vsel %vm1043_vm3, %v1032_v54, 0 }
 0x2b8   : > { %2395 = vmatpush3.bf16.xpose.msra.mxu0 %v1069_v59 }
 0x2ba   : > { %v1030_v52 = vpop.permute.xlu0 %1029  ;;  %v1034_v58 = vpop.permute.xlu1 %1033 }
 0x2bb   : > { %2507 = vmatprep.subr.msk.bf16.mxu0 %vm1043_vm3, %v1030_v52  ;;  %v1072_v53 = vsel %vm1043_vm3, %v1030_v52, 0  ;;  %v1078_v60 = vsel %vm1043_vm3, %v1034_v58, 0 }
 0x2be   : > { %v1036_v61 = vpop.permute.xlu0 %1035  ;;  %v1038_v63 = vpop.permute.xlu1 %1037 }
 0x2bf   : > { %v1081_v62 = vsel %vm1043_vm3, %v1036_v61, 0  ;;  %v1084_v0 = vsel %vm1043_vm3, %v1038_v63, 0 }
 0x2c0   : > { %2397 = vmatpush3.bf16.xpose.msra.mxu0 %v1072_v53 }
 0x2c1   : > { %2508 = vmatprep.subr.msk.bf16.mxu0 %vm1043_vm3, %v1032_v54 }
 0x2c2   : > { %v1040_v1 = vpop.permute.xlu0 %1039  ;;  %v1042_v3 = vpop.permute.xlu1 %1041 }
 0x2c3   : > { %v1087_v2 = vsel %vm1043_vm3, %v1040_v1, 0  ;;  %v1090_v4 = vsel %vm1043_vm3, %v1042_v3, 0 }
 0x2c6   : > { %v1310_v5 = vpop.permute.xlu0 %1309  ;;  %v1312_v6 = vpop.permute.xlu1 %1311 }
 0x2c7   : > { %2426 = vmatprep.subr.bf16.mxu1 %v1310_v5 }
 0x2c8   : > { %2399 = vmatpush3.bf16.xpose.msra.mxu0 %v1075_v57  ;;  %2427 = vmatpush3.bf16.msra.mxu1 %v1310_v5 }
 0x2c9   : > { %2509 = vmatprep.subr.msk.bf16.mxu0 %vm1043_vm3, %v1034_v58  ;;  %2428 = vmatprep.subr.bf16.mxu1 %v1312_v6 }
 0x2ca   : > { %v1314_v7 = vpop.permute.xlu0 %1313  ;;  %v1316_v8 = vpop.permute.xlu1 %1315 }
 0x2cc   : > { %2429 = vmatpush3.bf16.msra.mxu1 %v1312_v6 }
 0x2cd   : > { %2430 = vmatprep.subr.bf16.mxu1 %v1314_v7 }
 0x2ce   : > { %v1318_v9 = vpop.permute.xlu0 %1317  ;;  %v1320_v10 = vpop.permute.xlu1 %1319 }
 0x2d0   : > { %2401 = vmatpush3.bf16.xpose.msra.mxu0 %v1078_v60  ;;  %2431 = vmatpush3.bf16.msra.mxu1 %v1314_v7 }
 0x2d1   : > { %2510 = vmatprep.subr.msk.bf16.mxu0 %vm1043_vm3, %v1036_v61  ;;  %2432 = vmatprep.subr.bf16.mxu1 %v1316_v8 }
 0x2d4   : > { %2433 = vmatpush3.bf16.msra.mxu1 %v1316_v8 }
 0x2d5   : > { %2434 = vmatprep.subr.bf16.mxu1 %v1318_v9 }
 0x2d8   : > { %2403 = vmatpush3.bf16.xpose.msra.mxu0 %v1081_v62  ;;  %2435 = vmatpush3.bf16.msra.mxu1 %v1318_v9 }
 0x2d9   : > { %2511 = vmatprep.subr.msk.bf16.mxu0 %vm1043_vm3, %v1038_v63  ;;  %2436 = vmatprep.subr.bf16.mxu1 %v1320_v10 }
 0x2dc   : > { %2437 = vmatpush3.bf16.msra.mxu1 %v1320_v10 }
 0x2e0   : > { %2405 = vmatpush3.bf16.xpose.msra.mxu0 %v1084_v0 }
 0x2e1   : > { %2512 = vmatprep.subr.msk.bf16.mxu0 %vm1043_vm3, %v1040_v1 }
 0x2e8   : > { %2407 = vmatpush3.bf16.xpose.msra.mxu0 %v1087_v2 }
 0x2e9   : > { %2513 = vmatprep.subr.msk.bf16.mxu0 %vm1043_vm3, %v1042_v3 }
 0x2f0   : > { %2409 = vmatpush3.bf16.xpose.msra.mxu0 %v1090_v4 }
 0x2f7   : > { %2411 = vmatmul.mubr.msk.bf16.vlgmr.msra.gmra.mrb[0].mxu0 %vm1043_vm3, %v1005_v46 }
 0x2f8   : > { %2414 = vmatprep.mubr.msk.bf16.mxu0 %vm1043_vm3, %v1006_v45 }
 0x2ff   : > { %2415 = vmatmul.mubr.msk.bf16.gmra.mrb[4].mxu0 %vm1043_vm3, %v1007_v47 }
 0x300   : > { %2418 = vmatprep.mubr.msk.bf16.mxu0 %vm1043_vm3, %v1008_v48 }
 0x307   : > { %2419 = vmatmul.mubr.msk.bf16.gmra.mrb[8].mxu0 %vm1043_vm3, %v1009_v49 }
 0x308   : > { %2422 = vmatprep.mubr.msk.bf16.mxu0 %vm1043_vm3, %v3430_v50 }
 0x30f   : > { %2423 = vmatmul.mubr.msk.bf16.gmra.mrb[12].mxu0 %vm1043_vm3, %v3432_v51 }
 0x3ca   : > { %v2412_v12 = vpop.f32.mrb[0].mxu0 }
 0x3cb   : > { %v1135_v13 = vadd.f32 %v2412_v12, %v2267_v11  ;;  %v1126_v14 = vpop.f32.mrb[1].mxu0 }
 0x3cc   : > { %v1127_v15 = vadd.f32 %v2267_v11, %v1126_v14  ;;  %v2413_v16 = vpop.f32.mrb[2].mxu0 }
 0x3cd   : > { %1193 = vmax.xlane.f32.xlu1 %v1135_v13  ;;  %v1129_v17 = vpop.f32.mrb[3].mxu0  ;;  %v1138_v56 = vadd.f32 %v2413_v16, %v2267_v11 }
 0x3ce   : > { %1189 = vmax.xlane.f32.xlu0 %v1127_v15  ;;  %v1130_v19 = vadd.f32 %v2267_v11, %v1129_v17 }
 0x3d1   : > { %1195 = vmax.xlane.f32.xlu1 %v1138_v56 }
 0x3d2   : > { %v2416_v18 = vpop.f32.mrb[4].mxu0 }
 0x3d3   : > { %v1142_v20 = vpop.f32.mrb[5].mxu0  ;;  %v1151_v24 = vadd.f32 %v2416_v18, %v2267_v11 }
 0x3d4   : > { %v3472_v21 = vadd.f32 %v2267_v11, %v1142_v20  ;;  %v2417_v22 = vpop.f32.mrb[6].mxu0 }
 0x3d5   : > { %v1145_v23 = vpop.f32.mrb[7].mxu0  ;;  %1191 = vmax.xlane.f32.xlu1 %v1130_v19  ;;  %v3475_v26 = vadd.f32 %v2417_v22, %v2267_v11 }
 0x3d6   : > { %1197 = vmax.xlane.f32.xlu0 %v3472_v21  ;;  %v1146_v31 = vadd.f32 %v2267_v11, %v1145_v23 }
 0x3d9   : > { %1201 = vmax.xlane.f32.xlu1 %v1151_v24 }
 0x3da   : > { %v2420_v25 = vpop.f32.mrb[8].mxu0 }
 0x3db   : > { %v1158_v27 = vpop.f32.mrb[9].mxu0  ;;  %v3480_v32 = vadd.f32 %v2420_v25, %v2267_v11 }
 0x3dc   : > { %v2421_v28 = vpop.f32.mrb[10].mxu0  ;;  %v3500_v42 = vadd.f32 %v2267_v11, %v1158_v27 }
 0x3dd   : > { %1203 = vmax.xlane.f32.xlu1 %v3475_v26  ;;  %v3478_v29 = vadd.f32 %v2421_v28, %v2267_v11  ;;  %v1161_v30 = vpop.f32.mrb[11].mxu0 }
 0x3de   : > { %v3483_v36 = vadd.f32 %v2267_v11, %v1161_v30 }
 0x3e1   : > { %1199 = vmax.xlane.f32.xlu1 %v1146_v31 }
 0x3e2   : > { %v2424_v33 = vpop.f32.mrb[12].mxu0 }
 0x3e3   : > { %v1174_v34 = vpop.f32.mrb[13].mxu0  ;;  %v3490_v40 = vadd.f32 %v2424_v33, %v2267_v11 }
 0x3e4   : > { %v2425_v35 = vpop.f32.mrb[14].mxu0  ;;  %v3495_v41 = vadd.f32 %v2267_v11, %v1174_v34 }
 0x3e5   : > { %1209 = vmax.xlane.f32.xlu1 %v3480_v32  ;;  %v3485_v37 = vadd.f32 %v2425_v35, %v2267_v11  ;;  %v1177_v38 = vpop.f32.mrb[15].mxu0 }
 0x3e6   : > { %v3487_v39 = vadd.f32 %v2267_v11, %v1177_v38 }
 0x3e9   : > { %1207 = vmax.xlane.f32.xlu1 %v3483_v36 }
 0x3ec   : > { %1321 = vrot.lane.b32.xlu0 %v3430_v50, %s2970_s7 }
 0x3ed   : > { %1217 = vmax.xlane.f32.xlu1 %v3490_v40 }
 0x3f1   : > { %1213 = vmax.xlane.f32.xlu1 %v3495_v41 }
 0x402   : > { %1323 = vrot.lane.b32.xlu1 %v3432_v51, %s2970_s7  ;;  %s3922_s7 = sld [smem:[#allocation18_spill]] (!%p2277_p10) }
 0x40b   : > { %1205 = vmax.xlane.f32.xlu0 %v3500_v42 }
 0x40f   : > { %1211 = vmax.xlane.f32.xlu0 %v3478_v29 }
 0x413   : > { %1215 = vmax.xlane.f32.xlu0 %v3487_v39 }
 0x417   : > { %1219 = vmax.xlane.f32.xlu0 %v3485_v37 }
 0x45a   : > { %v1194_v43 = vpop.xlane.xlu1 %1193 }
 0x45b   : > { %v1223_v44 = vsub.f32 %v1135_v13, %v1194_v43  ;;  %v1190_v45 = vpop.xlane.xlu0 %1189 }
 0x45c   : > { %v1221_v46 = vsub.f32 %v1127_v15, %v1190_v45 }
 0x45d   : > { %v1241_v47 = vmul.f32 1.442695, %v1223_v44 }
 0x45e   : > { %v1237_v48 = vmul.f32 1.442695, %v1221_v46  ;;  %v1196_v49 = vpop.xlane.xlu1 %1195 }
 0x45f   : > { %2662 = vpow2.f32 %v1241_v47  ;;  %v1224_v50 = vsub.f32 %v1138_v56, %v1196_v49 }
 0x460   : > { %2664 = vpow2.f32 %v1237_v48 }
 0x461   : > { %v1243_v51 = vmul.f32 1.442695, %v1224_v50 }
 0x462   : > { %v1192_v55 = vpop.xlane.xlu1 %1191 }
 0x463   : > { %2666 = vpow2.f32 %v1243_v51  ;;  %v1222_v59 = vsub.f32 %v1130_v19, %v1192_v55  ;;  %v1198_v52 = vpop.xlane.xlu0 %1197 }
 0x464   : > { %v1225_v57 = vsub.f32 %v3472_v21, %v1198_v52 }
 0x465   : > { %v1239_v53 = vmul.f32 1.442695, %v1222_v59 }
 0x466   : > { %v1202_v54 = vpop.xlane.xlu1 %1201  ;;  %v1245_v1 = vmul.f32 1.442695, %v1225_v57 }
 0x467   : > { %2668 = vpow2.f32 %v1239_v53  ;;  %v1227_v58 = vsub.f32 %v1151_v24, %v1202_v54  ;;  %v1322_v60 = vpop.permute.xlu0 %1321 }
 0x468   : > { %2438 = vmatprep.subr.bf16.mxu1 %v1322_v60 }
 0x469   : > { %v2663_v61 = vpop.eup %2662  ;;  %v1249_v62 = vmul.f32 1.442695, %v1227_v58  ;;  %2439 = vmatpush3.bf16.msra.mxu1 %v1322_v60 }
 0x46a   : > { %v2665_v63 = vpop.eup %2664  ;;  %v1204_v0 = vpop.xlane.xlu1 %1203  ;;  %1273 = vadd.xlane.f32.xlu0 %v2663_v61 }
 0x46b   : > { %2670 = vpow2.f32 %v1249_v62  ;;  %v1228_v2 = vsub.f32 %v3475_v26, %v1204_v0  ;;  %1269 = vadd.xlane.f32.xlu1 %v2665_v63 }
 0x46c   : > { %2672 = vpow2.f32 %v1245_v1 }
 0x46d   : > { %v2667_v3 = vpop.eup %2666  ;;  %v1251_v5 = vmul.f32 1.442695, %v1228_v2 }
 0x46e   : > { %v1200_v4 = vpop.xlane.xlu1 %1199  ;;  %1275 = vadd.xlane.f32.xlu0 %v2667_v3  ;;  %v1302_v21 = vpack.c.bf16 %v2667_v3, %v2663_v61 }
 0x46f   : > { %v1226_v6 = vsub.f32 %v1146_v31, %v1200_v4  ;;  %2674 = vpow2.f32 %v1251_v5 }
 0x471   : > { %v2669_v7 = vpop.eup %2668  ;;  %v1247_v8 = vmul.f32 1.442695, %v1226_v6 }
 0x472   : > { %v1210_v9 = vpop.xlane.xlu1 %1209  ;;  %1271 = vadd.xlane.f32.xlu0 %v2669_v7  ;;  %v1301_v10 = vpack.c.bf16 %v2669_v7, %v2665_v63 }
 0x473   : > { %v1231_v11 = vsub.f32 %v3480_v32, %v1210_v9  ;;  %2676 = vpow2.f32 %v1247_v8 }
 0x474   : > { %2442 = vmatprep.mubr.bf16.mxu1 %v1301_v10 }
 0x475   : > { %v2671_v12 = vpop.eup %2670  ;;  %v1257_v13 = vmul.f32 1.442695, %v1231_v11 }
 0x476   : > { %v1208_v14 = vpop.xlane.xlu1 %1207  ;;  %1281 = vadd.xlane.f32.xlu0 %v2671_v12  ;;  %v2673_v15 = vpop.eup %2672 }
 0x477   : > { %2678 = vpow2.f32 %v1257_v13  ;;  %v1230_v24 = vsub.f32 %v3483_v36, %v1208_v14 }
 0x479   : > { %v2675_v17 = vpop.eup %2674  ;;  %v1255_v25 = vmul.f32 1.442695, %v1230_v24 }
 0x47a   : > { %v1218_v16 = vpop.xlane.xlu1 %1217  ;;  %1277 = vadd.xlane.f32.xlu0 %v2673_v15  ;;  %v1304_v23 = vpack.c.bf16 %v2675_v17, %v2671_v12 }
 0x47b   : > { %2680 = vpow2.f32 %v1255_v25  ;;  %v1235_v31 = vsub.f32 %v3490_v40, %v1218_v16 }
 0x47d   : > { %v2677_v18 = vpop.eup %2676  ;;  %v1265_v38 = vmul.f32 1.442695, %v1235_v31 }
 0x47e   : > { %v1214_v56 = vpop.xlane.xlu1 %1213  ;;  %1283 = vadd.xlane.f32.xlu0 %v2675_v17  ;;  %v1303_v22 = vpack.c.bf16 %v2677_v18, %v2673_v15 }
 0x47f   : > { %v1233_v26 = vsub.f32 %v3495_v41, %v1214_v56 }
 0x481   : > { %v2679_v19 = vpop.eup %2678  ;;  %v1261_v32 = vmul.f32 1.442695, %v1233_v26 }
 0x482   : > { %v1324_v20 = vpop.permute.xlu1 %1323  ;;  %1289 = vadd.xlane.f32.xlu1 %v2679_v19  ;;  %1279 = vadd.xlane.f32.xlu0 %v2677_v18 }
 0x483   : > { %2440 = vmatprep.subr.bf16.mxu1 %v1324_v20 }
 0x484   : > { %2441 = vmatpush3.bf16.msra.mxu1 %v1324_v20 }
 0x485   : > { %v2681_v45 = vpop.eup %2680 }
 0x487   : > { %2443 = vmatmul.mubr.bf16.vlgmr.msra.gmra.mrb[0].mxu1 %v1302_v21 }
 0x488   : > { %2446 = vmatprep.mubr.bf16.mxu1 %v1303_v22 }
 0x48f   : > { %2447 = vmatmul.mubr.bf16.gmra.mrb[4].mxu1 %v1304_v23 }
 0x498   : > { %v1206_v27 = vpop.xlane.xlu0 %1205 }
 0x499   : > { %v1229_v28 = vsub.f32 %v3500_v42, %v1206_v27 }
 0x49b   : > { %v1253_v30 = vmul.f32 1.442695, %v1229_v28 }
 0x49c   : > { %v1212_v33 = vpop.xlane.xlu0 %1211 }
 0x49d   : > { %2682 = vpow2.f32 %v1253_v30  ;;  %v1232_v34 = vsub.f32 %v3478_v29, %v1212_v33 }
 0x49e   : > { %2684 = vpow2.f32 %v1261_v32 }
 0x49f   : > { %v1259_v35 = vmul.f32 1.442695, %v1232_v34 }
 0x4a0   : > { %v1216_v43 = vpop.xlane.xlu0 %1215 }
 0x4a1   : > { %2686 = vpow2.f32 %v1259_v35  ;;  %v1234_v36 = vsub.f32 %v3487_v39, %v1216_v43 }
 0x4a2   : > { %2688 = vpow2.f32 %v1265_v38 }
 0x4a3   : > { %v1263_v41 = vmul.f32 1.442695, %v1234_v36 }
 0x4a4   : > { %v1220_v44 = vpop.xlane.xlu0 %1219 }
 0x4a5   : > { %2690 = vpow2.f32 %v1263_v41  ;;  %v1236_v42 = vsub.f32 %v3485_v37, %v1220_v44 }
 0x4a7   : > { %v2683_v40 = vpop.eup %2682  ;;  %v1267_v46 = vmul.f32 1.442695, %v1236_v42 }
 0x4a8   : > { %1285 = vadd.xlane.f32.xlu1 %v2683_v40  ;;  %v1305_v47 = vpack.c.bf16 %v2681_v45, %v2683_v40  ;;  %v2685_v29 = vpop.eup %2684 }
 0x4a9   : > { %2692 = vpow2.f32 %v1267_v46 }
 0x4aa   : > { %2450 = vmatprep.mubr.bf16.mxu1 %v1305_v47 }
 0x4ab   : > { %v2687_v48 = vpop.eup %2686 }
 0x4ac   : > { %1293 = vadd.xlane.f32.xlu1 %v2685_v29  ;;  %1291 = vadd.xlane.f32.xlu0 %v2687_v48  ;;  %v1306_v49 = vpack.c.bf16 %v2687_v48, %v2679_v19  ;;  %v2689_v50 = vpop.eup %2688 }
 0x4ae   : > { %2451 = vmatmul.mubr.bf16.gmra.mrb[8].mxu1 %v1306_v49 }
 0x4af   : > { %v2691_v39 = vpop.eup %2690 }
 0x4b0   : > { %1297 = vadd.xlane.f32.xlu1 %v2689_v50  ;;  %1287 = vadd.xlane.f32.xlu0 %v2681_v45  ;;  %v1307_v51 = vpack.c.bf16 %v2691_v39, %v2685_v29 }
 0x4b2   : > { %2454 = vmatprep.mubr.bf16.mxu1 %v1307_v51 }
 0x4b3   : > { %v2693_v37 = vpop.eup %2692 }
 0x4b4   : > { %1295 = vadd.xlane.f32.xlu0 %v2691_v39  ;;  %v1308_v55 = vpack.c.bf16 %v2693_v37, %v2689_v50 }
 0x4b6   : > { %2455 = vmatmul.mubr.bf16.gmra.mrb[12].mxu1 %v1308_v55 }
 0x4b8   : > { %1299 = vadd.xlane.f32.xlu0 %v2693_v37 }
 0x4f7   : > { %v1274_v59 = vpop.xlane.xlu0 %1273 }
 0x4f8   : > { %v1270_v58 = vpop.xlane.xlu1 %1269  ;;  %2694 = vrcp.f32 %v1274_v59 }
 0x4f9   : > { %2696 = vrcp.f32 %v1270_v58 }
 0x4fb   : > { %v1276_v52 = vpop.xlane.xlu0 %1275 }
 0x4fc   : > { %2698 = vrcp.f32 %v1276_v52 }
 0x4ff   : > { %v1272_v53 = vpop.xlane.xlu0 %1271 }
 0x500   : > { %2700 = vrcp.f32 %v1272_v53 }
 0x502   : > { %v2695_v62 = vpop.eup %2694 }
 0x503   : > { %v1282_v54 = vpop.xlane.xlu0 %1281  ;;  %v2697_v0 = vpop.eup %2696 }
 0x504   : > { %2702 = vrcp.f32 %v1282_v54 }
 0x506   : > { %v2699_v2 = vpop.eup %2698 }
 0x507   : > { %v1278_v57 = vpop.xlane.xlu0 %1277 }
 0x508   : > { %2704 = vrcp.f32 %v1278_v57 }
 0x50a   : > { %v2701_v4 = vpop.eup %2700 }
 0x50b   : > { %v1284_v60 = vpop.xlane.xlu0 %1283 }
 0x50c   : > { %2706 = vrcp.f32 %v1284_v60 }
 0x50e   : > { %v2703_v12 = vpop.eup %2702 }
 0x50f   : > { %v1280_v61 = vpop.xlane.xlu0 %1279  ;;  %v1290_v26 = vpop.xlane.xlu1 %1289 }
 0x510   : > { %2708 = vrcp.f32 %v1280_v61 }
 0x511   : > { %2710 = vrcp.f32 %v1290_v26 }
 0x512   : > { %v2705_v14 = vpop.eup %2704 }
 0x516   : > { %v2707_v16 = vpop.eup %2706 }
 0x51a   : > { %v2709_v56 = vpop.eup %2708 }
 0x51b   : > { %v2711_v34 = vpop.eup %2710 }
 0x535   : > { %v1286_v27 = vpop.xlane.xlu1 %1285 }
 0x536   : > { %2712 = vrcp.f32 %v1286_v27 }
 0x539   : > { %v1292_v25 = vpop.xlane.xlu0 %1291  ;;  %v1294_v30 = vpop.xlane.xlu1 %1293 }
 0x53a   : > { %2714 = vrcp.f32 %v1292_v25 }
 0x53d   : > { %v1288_v28 = vpop.xlane.xlu0 %1287  ;;  %v1298_v32 = vpop.xlane.xlu1 %1297 }
 0x53e   : > { %2716 = vrcp.f32 %v1288_v28 }
 0x53f   : > { %2718 = vrcp.f32 %v1294_v30 }
 0x540   : > { %2720 = vrcp.f32 %v1298_v32  ;;  %v2713_v38 = vpop.eup %2712 }
 0x541   : > { %v1296_v31 = vpop.xlane.xlu0 %1295 }
 0x544   : > { %v2715_v36 = vpop.eup %2714 }
 0x545   : > { %v1300_v33 = vpop.xlane.xlu0 %1299 }
 0x546   : > { %2722 = vrcp.f32 %v1300_v33 }
 0x547   : > { %2724 = vrcp.f32 %v1296_v31 }
 0x548   : > { %v2717_v44 = vpop.eup %2716 }
 0x549   : > { %v2719_v49 = vpop.eup %2718 }
 0x54a   : > { %v2721_v39 = vpop.eup %2720 }
 0x550   : > { %v2723_v37 = vpop.eup %2722 }
 0x551   : > { %v2725_v59 = vpop.eup %2724 }
 0x55a   : > { %v2444_v63 = vpop.f32.mrb[0].mxu1 }
 0x55b   : > { %v1367_v1 = vpop.f32.mrb[1].mxu1  ;;  %v1448_v5 = vmul.f32 %v2695_v62, %v2444_v63 }
 0x55c   : > { %v2445_v3 = vpop.f32.mrb[2].mxu1  ;;  %v1446_v8 = vmul.f32 %v2697_v0, %v1367_v1 }
 0x55d   : > { %v1449_v6 = vmul.f32 %v2699_v2, %v2445_v3  ;;  %v1370_v7 = vpop.f32.mrb[3].mxu1 }
 0x55e   : > { %v1447_v9 = vmul.f32 %v2701_v4, %v1370_v7 }
 0x55f   : > { %v1463_v10 = vpack.c.bf16 %v1449_v6, %v1448_v5  ;;  %v2726_v5 = vld [vmem:[#allocation9] sm:$0xff] (!%p2277_p10)   ;;  %v2727_v6 = vld [vmem:[#allocation9 + $0x8] sm:$0xff] (!%p2277_p10)  }
 0x560   : > { %v1462_v11 = vpack.c.bf16 %v1447_v9, %v1446_v8  ;;  %2458 = vmatprep.subr.bf16.mxu0 (!%p2277_p10), %v2726_v5  ;;  %2490 = vmatprep.subr.bf16.mxu1 (!%p2277_p10), %v2726_v5  ;;  %v2728_v8 = vld [vmem:[#allocation9 + $0x10] sm:$0xff] (!%p2277_p10)  }
 0x561   : > { %1473 = vst.msk [vmem:[%s3518_s19 + $0x8] sm:$0xff] %vm1043_vm3, %v1463_v10  ;;  %2459 = vmatpush3.bf16.msra.mxu0 (!%p2277_p10), %v2726_v5  ;;  %2498 = vmatpush3.bf16.msra.mxu1 (!%p2277_p10), %v2726_v5 }
 0x562   : > { %1472 = vst.msk [vmem:[%s3518_s19] sm:$0xff] %vm1043_vm3, %v1462_v11  ;;  %v2448_v13 = vpop.f32.mrb[4].mxu1  ;;  %2460 = vmatprep.subr.bf16.mxu0 (!%p2277_p10), %v2727_v6  ;;  %2491 = vmatprep.subr.bf16.mxu1 (!%p2277_p10), %v2727_v6  ;;  %v2729_v11 = vld [vmem:[#allocation9 + $0x18] sm:$0xff] (!%p2277_p10)  }
 0x563   : > { %v1383_v15 = vpop.f32.mrb[5].mxu1  ;;  %v1452_v18 = vmul.f32 %v2703_v12, %v2448_v13 }
 0x564   : > { %v2449_v17 = vpop.f32.mrb[6].mxu1  ;;  %v1450_v21 = vmul.f32 %v2705_v14, %v1383_v15  ;;  %v2730_v14 = vld [vmem:[#allocation9 + $0x20] sm:$0xff] (!%p2277_p10)  }
 0x565   : > { %v1453_v19 = vmul.f32 %v2707_v16, %v2449_v17  ;;  %v1386_v20 = vpop.f32.mrb[7].mxu1  ;;  %2461 = vmatpush3.bf16.msra.mxu0 (!%p2277_p10), %v2727_v6  ;;  %2499 = vmatpush3.bf16.msra.mxu1 (!%p2277_p10), %v2727_v6  ;;  %v2731_v17 = vld [vmem:[#allocation9 + $0x28] sm:$0xff] (!%p2277_p10)  }
 0x566   : > { %v1451_v22 = vmul.f32 %v2709_v56, %v1386_v20  ;;  %2462 = vmatprep.subr.bf16.mxu0 (!%p2277_p10), %v2728_v8  ;;  %2492 = vmatprep.subr.bf16.mxu1 (!%p2277_p10), %v2728_v8 }
 0x567   : > { %v1465_v23 = vpack.c.bf16 %v1453_v19, %v1452_v18  ;;  %v2732_v19 = vld [vmem:[#allocation9 + $0x30] sm:$0xff] (!%p2277_p10)  }
 0x568   : > { %v1464_v24 = vpack.c.bf16 %v1451_v22, %v1450_v21  ;;  %v2733_v22 = vld [vmem:[#allocation9 + $0x38] sm:$0xff] (!%p2277_p10)  }
 0x569   : > { %1475 = vst.msk [vmem:[%s3518_s19 + $0x18] sm:$0xff] %vm1043_vm3, %v1465_v23  ;;  %2463 = vmatpush3.bf16.msra.mxu0 (!%p2277_p10), %v2728_v8  ;;  %2500 = vmatpush3.bf16.msra.mxu1 (!%p2277_p10), %v2728_v8 }
 0x56a   : > { %1474 = vst.msk [vmem:[%s3518_s19 + $0x10] sm:$0xff] %vm1043_vm3, %v1464_v24  ;;  %2464 = vmatprep.subr.bf16.mxu0 (!%p2277_p10), %v2729_v11  ;;  %2493 = vmatprep.subr.bf16.mxu1 (!%p2277_p10), %v2729_v11 }
 0x56d   : > { %2465 = vmatpush3.bf16.msra.mxu0 (!%p2277_p10), %v2729_v11  ;;  %2501 = vmatpush3.bf16.msra.mxu1 (!%p2277_p10), %v2729_v11 }
 0x56e   : > { %2466 = vmatprep.subr.bf16.mxu0 (!%p2277_p10), %v2730_v14  ;;  %2494 = vmatprep.subr.bf16.mxu1 (!%p2277_p10), %v2730_v14 }
 0x571   : > { %2467 = vmatpush3.bf16.msra.mxu0 (!%p2277_p10), %v2730_v14  ;;  %2502 = vmatpush3.bf16.msra.mxu1 (!%p2277_p10), %v2730_v14 }
 0x572   : > { %2468 = vmatprep.subr.bf16.mxu0 (!%p2277_p10), %v2731_v17  ;;  %2495 = vmatprep.subr.bf16.mxu1 (!%p2277_p10), %v2731_v17 }
 0x575   : > { %2469 = vmatpush3.bf16.msra.mxu0 (!%p2277_p10), %v2731_v17  ;;  %2503 = vmatpush3.bf16.msra.mxu1 (!%p2277_p10), %v2731_v17 }
 0x576   : > { %2470 = vmatprep.subr.bf16.mxu0 (!%p2277_p10), %v2732_v19  ;;  %2496 = vmatprep.subr.bf16.mxu1 (!%p2277_p10), %v2732_v19 }
 0x579   : > { %2471 = vmatpush3.bf16.msra.mxu0 (!%p2277_p10), %v2732_v19  ;;  %2504 = vmatpush3.bf16.msra.mxu1 (!%p2277_p10), %v2732_v19 }
 0x57a   : > { %2472 = vmatprep.subr.bf16.mxu0 (!%p2277_p10), %v2733_v22  ;;  %2497 = vmatprep.subr.bf16.mxu1 (!%p2277_p10), %v2733_v22 }
 0x57d   : > { %2473 = vmatpush3.bf16.msra.mxu0 (!%p2277_p10), %v2733_v22  ;;  %2505 = vmatpush3.bf16.msra.mxu1 (!%p2277_p10), %v2733_v22 }
 0x581   : > { %v2452_v35 = vpop.f32.mrb[8].mxu1 }
 0x582   : > { %v1399_v43 = vpop.f32.mrb[9].mxu1  ;;  %v1456_v42 = vmul.f32 %v2711_v34, %v2452_v35 }
 0x583   : > { %v2453_v41 = vpop.f32.mrb[10].mxu1  ;;  %v1454_v46 = vmul.f32 %v2713_v38, %v1399_v43 }
 0x584   : > { %v1457_v45 = vmul.f32 %v2715_v36, %v2453_v41  ;;  %v1402_v40 = vpop.f32.mrb[11].mxu1 }
 0x585   : > { %v1455_v47 = vmul.f32 %v2717_v44, %v1402_v40 }
 0x586   : > { %v1467_v29 = vpack.c.bf16 %v1457_v45, %v1456_v42 }
 0x587   : > { %v1466_v48 = vpack.c.bf16 %v1455_v47, %v1454_v46 }
 0x588   : > { %1477 = vst.msk [vmem:[%s3518_s19 + $0x28] sm:$0xff] %vm1043_vm3, %v1467_v29 }
 0x589   : > { %1476 = vst.msk [vmem:[%s3518_s19 + $0x20] sm:$0xff] %vm1043_vm3, %v1466_v48  ;;  %v2456_v50 = vpop.f32.mrb[12].mxu1 }
 0x58a   : > { %v1415_v51 = vpop.f32.mrb[13].mxu1  ;;  %v1460_v52 = vmul.f32 %v2721_v39, %v2456_v50 }
 0x58b   : > { %v2457_v55 = vpop.f32.mrb[14].mxu1  ;;  %v1458_v57 = vmul.f32 %v2719_v49, %v1415_v51  ;;  %1483 = sbr.rel (%p2277_p10) target bundleno = 2135 (0x857), region = 72 }
 0x58c   : > { %v1461_v53 = vmul.f32 %v2723_v37, %v2457_v55  ;;  %v1418_v54 = vpop.f32.mrb[15].mxu1 }
 0x58d   : > { %v1459_v58 = vmul.f32 %v2725_v59, %v1418_v54 }
 0x58e   : > { %v1469_v60 = vpack.c.bf16 %v1461_v53, %v1460_v52 }
 0x58f   : > { %v1468_v61 = vpack.c.bf16 %v1459_v58, %v1458_v57 }
 0x590   : > { %1479 = vst.msk [vmem:[%s3518_s19 + $0x38] sm:$0xff] %vm1043_vm3, %v1469_v60 }
 0x591   : > { %1478 = vst.msk [vmem:[%s3518_s19 + $0x30] sm:$0xff] %vm1043_vm3, %v1468_v61 }
 0x598   : > { %v1494_v62 = vld [vmem:[#allocation3 + $0x48] sm:$0xff]  ;;  %v1493_v63 = vld [vmem:[#allocation3 + $0x40] sm:$0xff]  ;;  %v1499_v15 = vld [vmem:[#allocation3 + $0x70] sm:$0xff] }
 0x599   : > { %1529 = vrot.lane.b32.xlu1 %v1494_v62, %s2971_s25  ;;  %1527 = vrot.lane.b32.xlu0 %v1493_v63, %s2971_s25  ;;  %v1498_v0 = vld [vmem:[#allocation3 + $0x68] sm:$0xff]  ;;  %v1497_v1 = vld [vmem:[#allocation3 + $0x60] sm:$0xff]  ;;  %v1495_v16 = vld [vmem:[#allocation3 + $0x50] sm:$0xff] }
 0x59a   : > { %v1506_v2 = vld [vmem:[#allocation3 + $0xa0] sm:$0xff]  ;;  %v1507_v4 = vld [vmem:[#allocation3 + $0xa8] sm:$0xff]  ;;  %v1500_v56 = vld [vmem:[#allocation3 + $0x78] sm:$0xff] }
 0x59b   : > { %v1502_v3 = vld [vmem:[#allocation3 + $0x80] sm:$0xff]  ;;  %v1503_v7 = vld [vmem:[#allocation3 + $0x88] sm:$0xff]  ;;  %v1496_v18 = vld [vmem:[#allocation3 + $0x58] sm:$0xff] }
 0x59c   : > { %v1515_v9 = vld [vmem:[#allocation3 + $0xe0] sm:$0xff]  ;;  %v1516_v12 = vld [vmem:[#allocation3 + $0xe8] sm:$0xff]  ;;  %v1508_v20 = vld [vmem:[#allocation3 + $0xb0] sm:$0xff] }
 0x59d   : > { %1537 = vrot.lane.b32.xlu1 %v1498_v0, %s2971_s25  ;;  %1535 = vrot.lane.b32.xlu0 %v1497_v1, %s2971_s25  ;;  %v1511_v10 = vld [vmem:[#allocation3 + $0xc0] sm:$0xff]  ;;  %v1512_v13 = vld [vmem:[#allocation3 + $0xc8] sm:$0xff]  ;;  %v1504_v21 = vld [vmem:[#allocation3 + $0x90] sm:$0xff] }
 0x59e   : > { %v1509_v23 = vld [vmem:[#allocation3 + $0xb8] sm:$0xff]  ;;  %v1517_v25 = vld [vmem:[#allocation3 + $0xf0] sm:$0xff]  ;;  %v1484_v38 = vld [vmem:[#allocation3] sm:$0xff] }
 0x59f   : > { %v1505_v24 = vld [vmem:[#allocation3 + $0x98] sm:$0xff]  ;;  %v1513_v26 = vld [vmem:[#allocation3 + $0xd0] sm:$0xff]  ;;  %v1488_v43 = vld [vmem:[#allocation3 + $0x20] sm:$0xff] }
 0x5a0   : > { %v1518_v27 = vld [vmem:[#allocation3 + $0xf8] sm:$0xff]  ;;  %v1489_v44 = vld [vmem:[#allocation3 + $0x28] sm:$0xff]  ;;  %v1490_v0 = vld [vmem:[#allocation3 + $0x30] sm:$0xff] }
 0x5a1   : > { %1559 = vrot.lane.b32.xlu1 %v1506_v2, %s2972_s17  ;;  %1551 = vrot.lane.b32.xlu0 %v1502_v3, %s2972_s17  ;;  %v1514_v28 = vld [vmem:[#allocation3 + $0xd8] sm:$0xff]  ;;  %v1485_v40 = vld [vmem:[#allocation3 + $0x8] sm:$0xff]  ;;  %v1486_v1 = vld [vmem:[#allocation3 + $0x10] sm:$0xff] }
 0x5a2   : > { %v1491_v5 = vld [vmem:[#allocation3 + $0x38] sm:$0xff] }
 0x5a5   : > { %1561 = vrot.lane.b32.xlu1 %v1507_v4, %s2972_s17  ;;  %1553 = vrot.lane.b32.xlu0 %v1503_v7, %s2972_s17  ;;  %v1487_v7 = vld [vmem:[#allocation3 + $0x18] sm:$0xff] }
 0x5a9   : > { %1583 = vrot.lane.b32.xlu1 %v1515_v9, %s2973_s30  ;;  %1575 = vrot.lane.b32.xlu0 %v1511_v10, %s2973_s30 }
 0x5ad   : > { %1585 = vrot.lane.b32.xlu1 %v1516_v12, %s2973_s30  ;;  %1577 = vrot.lane.b32.xlu0 %v1512_v13, %s2973_s30 }
 0x5b1   : > { %1539 = vrot.lane.b32.xlu1 %v1499_v15, %s2971_s25  ;;  %1531 = vrot.lane.b32.xlu0 %v1495_v16, %s2971_s25 }
 0x5b5   : > { %1541 = vrot.lane.b32.xlu1 %v1500_v56, %s2971_s25  ;;  %1533 = vrot.lane.b32.xlu0 %v1496_v18, %s2971_s25 }
 0x5b9   : > { %1563 = vrot.lane.b32.xlu1 %v1508_v20, %s2972_s17  ;;  %1555 = vrot.lane.b32.xlu0 %v1504_v21, %s2972_s17  ;;  %v3588_v21 = vld [vmem:[%s3890_s5] ss:$0 sm:$0xff] }
 0x5bd   : > { %1565 = vrot.lane.b32.xlu1 %v1509_v23, %s2972_s17  ;;  %1557 = vrot.lane.b32.xlu0 %v1505_v24, %s2972_s17  ;;  %v1835_v24 = vld [vmem:[%s3224_s24 + $0x50] sm:$0xff] }
 0x5c1   : > { %1587 = vrot.lane.b32.xlu1 %v1517_v25, %s2973_s30  ;;  %1579 = vrot.lane.b32.xlu0 %v1513_v26, %s2973_s30  ;;  %v1827_v25 = vld [vmem:[%s3224_s24 + $0x10] sm:$0xff] }
 0x5c5   : > { %1589 = vrot.lane.b32.xlu1 %v1518_v27, %s2973_s30  ;;  %1581 = vrot.lane.b32.xlu0 %v1514_v28, %s2973_s30 }
 0x60b   : > { %v1530_v30 = vpop.permute.xlu1 %1529  ;;  %v1528_v31 = vpop.permute.xlu0 %1527 }
 0x60c   : > { %v1593_v42 = vsel %vm1043_vm3, %v1484_v38, %v1528_v31  ;;  %v1596_v51 = vsel %vm1043_vm3, %v1485_v40, %v1530_v30 }
 0x60f   : > { %v1538_v32 = vpop.permute.xlu1 %1537  ;;  %v1536_v33 = vpop.permute.xlu0 %1535 }
 0x610   : > { %v1605_v45 = vsel %vm1043_vm3, %v1488_v43, %v1536_v33  ;;  %v1608_v49 = vsel %vm1043_vm3, %v1489_v44, %v1538_v32  ;;  %v1825_v44 = vld [vmem:[%s3224_s24] sm:$0xff] }
 0x613   : > { %v1560_v34 = vpop.permute.xlu1 %1559  ;;  %v1552_v35 = vpop.permute.xlu0 %1551 }
 0x614   : > { %v1625_v46 = vsel %vm1615_vm4, %v1605_v45, %v1560_v34  ;;  %v1617_v47 = vsel %vm1615_vm4, %v1593_v42, %v1552_v35 }
 0x617   : > { %v1562_v36 = vpop.permute.xlu1 %1561  ;;  %v1554_v41 = vpop.permute.xlu0 %1553 }
 0x618   : > { %v1627_v37 = vsel %vm1615_vm4, %v1608_v49, %v1562_v36  ;;  %v1619_v55 = vsel %vm1615_vm4, %v1596_v51, %v1554_v41  ;;  %v1833_v41 = vld [vmem:[%s3224_s24 + $0x40] sm:$0xff] }
 0x61b   : > { %v1584_v29 = vpop.permute.xlu1 %1583  ;;  %v1576_v48 = vpop.permute.xlu0 %1575 }
 0x61c   : > { %v1634_v50 = vsel %vm1632_vm5, %v1617_v47, %v1576_v48  ;;  %v1646_v39 = vsel %vm1632_vm5, %v1625_v46, %v1584_v29  ;;  %v1826_v47 = vld [vmem:[%s3224_s24 + $0x8] sm:$0xff]  ;;  %v1828_v29 = vld [vmem:[%s3224_s24 + $0x18] sm:$0xff] }
 0x61d   : > { %2474 = vmatprep.mubr.bf16.mxu0 %v1634_v50  ;;  %2482 = vmatprep.mubr.bf16.mxu1 %v1646_v39  ;;  %v1836_v39 = vld [vmem:[%s3224_s24 + $0x58] sm:$0xff] }
 0x61f   : > { %v1586_v59 = vpop.permute.xlu1 %1585  ;;  %v1578_v52 = vpop.permute.xlu0 %1577 }
 0x620   : > { %v1637_v53 = vsel %vm1632_vm5, %v1619_v55, %v1578_v52  ;;  %v1649_v54 = vsel %vm1632_vm5, %v1627_v37, %v1586_v59  ;;  %v1834_v55 = vld [vmem:[%s3224_s24 + $0x48] sm:$0xff] }
 0x621   : > { %2475 = vmatmul.mubr.bf16.vlgmr.msra.gmra.mrb[0].mxu0 %v1637_v53  ;;  %2483 = vmatmul.mubr.bf16.vlgmr.msra.gmra.mrb[0].mxu1 %v1649_v54  ;;  %v1831_v54 = vld [vmem:[%s3224_s24 + $0x30] sm:$0xff] }
 0x623   : > { %v1540_v57 = vpop.permute.xlu1 %1539  ;;  %v1532_v58 = vpop.permute.xlu0 %1531 }
 0x624   : > { %v1611_v4 = vsel %vm1043_vm3, %v1490_v0, %v1540_v57  ;;  %v1599_v6 = vsel %vm1043_vm3, %v1486_v1, %v1532_v58 }
 0x627   : > { %v1542_v60 = vpop.permute.xlu1 %1541  ;;  %v1534_v61 = vpop.permute.xlu0 %1533 }
 0x628   : > { %v1614_v12 = vsel %vm1043_vm3, %v1491_v5, %v1542_v60  ;;  %v1602_v15 = vsel %vm1043_vm3, %v1487_v7, %v1534_v61  ;;  %v1829_v5 = vld [vmem:[%s3224_s24 + $0x20] sm:$0xff] }
 0x62b   : > { %v1564_v62 = vpop.permute.xlu1 %1563  ;;  %v1556_v63 = vpop.permute.xlu0 %1555 }
 0x62c   : > { %v1629_v8 = vsel %vm1615_vm4, %v1611_v4, %v1564_v62  ;;  %v1621_v9 = vsel %vm1615_vm4, %v1599_v6, %v1556_v63  ;;  %v1832_v63 = vld [vmem:[%s3224_s24 + $0x38] sm:$0xff] }
 0x62f   : > { %v1566_v2 = vpop.permute.xlu1 %1565  ;;  %v1558_v3 = vpop.permute.xlu0 %1557 }
 0x630   : > { %v1631_v16 = vsel %vm1615_vm4, %v1614_v12, %v1566_v2  ;;  %v1623_v17 = vsel %vm1615_vm4, %v1602_v15, %v1558_v3 }
 0x633   : > { %v1588_v10 = vpop.permute.xlu1 %1587  ;;  %v1580_v11 = vpop.permute.xlu0 %1579 }
 0x634   : > { %v1640_v13 = vsel %vm1632_vm5, %v1621_v9, %v1580_v11  ;;  %v1652_v14 = vsel %vm1632_vm5, %v1629_v8, %v1588_v10  ;;  %v1830_v8 = vld [vmem:[%s3224_s24 + $0x28] sm:$0xff]  ;;  %v1837_v11 = vld [vmem:[%s3224_s24 + $0x60] sm:$0xff] }
 0x635   : > { %2478 = vmatprep.mubr.bf16.mxu0 %v1640_v13  ;;  %2486 = vmatprep.mubr.bf16.mxu1 %v1652_v14  ;;  %v1838_v14 = vld [vmem:[%s3224_s24 + $0x68] sm:$0xff] }
 0x637   : > { %v1590_v56 = vpop.permute.xlu1 %1589  ;;  %v1582_v18 = vpop.permute.xlu0 %1581 }
 0x638   : > { %v1643_v19 = vsel %vm1632_vm5, %v1623_v17, %v1582_v18  ;;  %v1655_v20 = vsel %vm1632_vm5, %v1631_v16, %v1590_v56  ;;  %v1839_v17 = vld [vmem:[%s3224_s24 + $0x70] sm:$0xff] }
 0x639   : > { %2479 = vmatmul.mubr.bf16.gmra.mrb[4].mxu0 %v1643_v19  ;;  %2487 = vmatmul.mubr.bf16.gmra.mrb[4].mxu1 %v1655_v20  ;;  %v1840_v19 = vld [vmem:[%s3224_s24 + $0x78] sm:$0xff] }
 0x6f4   : > { %v2476_v22 = vpop.f32.mrb[0].mxu0  ;;  %v2484_v23 = vpop.f32.mrb[0].mxu1 }
 0x6f5   : > { %v1771_v26 = vadd.f32 %v2476_v22, %v3588_v21  ;;  %v1803_v27 = vadd.f32 %v2484_v23, %v3588_v21  ;;  %v1762_v28 = vpop.f32.mrb[1].mxu0  ;;  %v1794_v30 = vpop.f32.mrb[1].mxu1 }
 0x6f6   : > { %v2477_v31 = vpop.f32.mrb[2].mxu0  ;;  %v2485_v32 = vpop.f32.mrb[2].mxu1  ;;  %v1763_v33 = vadd.f32 %v3588_v21, %v1762_v28  ;;  %v1795_v34 = vadd.f32 %v3588_v21, %v1794_v30 }
 0x6f7   : > { %v1765_v35 = vpop.f32.mrb[3].mxu0  ;;  %v1797_v38 = vpop.f32.mrb[3].mxu1  ;;  %v3596_v43 = vadd.f32 %v1835_v24, %v1803_v27  ;;  %v3598_v36 = vadd.f32 %v1827_v25, %v1771_v26  ;;  %v1774_v42 = vadd.f32 %v2477_v31, %v3588_v21  ;;  %v1806_v48 = vadd.f32 %v2485_v32, %v3588_v21 }
 0x6f8   : > { %v1766_v45 = vadd.f32 %v3588_v21, %v1765_v35  ;;  %v3606_v40 = vadd.f32 %v1833_v41, %v1795_v34  ;;  %v3608_v46 = vadd.f32 %v1825_v44, %v1763_v33  ;;  %v1798_v51 = vadd.f32 %v3588_v21, %v1797_v38 }
 0x6f9   : > { %1877 = vadd.xlane.f32.xlu1 %v3596_v43  ;;  %1861 = vadd.xlane.f32.xlu0 %v3598_v36  ;;  %v3617_v50 = vadd.f32 %v1828_v29, %v1774_v42  ;;  %v3623_v37 = vadd.f32 %v1836_v39, %v1806_v48 }
 0x6fa   : > { %v3615_v49 = vadd.f32 %v1826_v47, %v1766_v45  ;;  %v3627_v59 = vadd.f32 %v1834_v55, %v1798_v51 }
 0x6fd   : > { %1873 = vadd.xlane.f32.xlu1 %v3606_v40  ;;  %1857 = vadd.xlane.f32.xlu0 %v3608_v46 }
 0x701   : > { %1859 = vadd.xlane.f32.xlu1 %v3615_v49  ;;  %1863 = vadd.xlane.f32.xlu0 %v3617_v50 }
 0x705   : > { %1879 = vadd.xlane.f32.xlu0 %v3623_v37 }
 0x709   : > { %1875 = vadd.xlane.f32.xlu0 %v3627_v59 }
 0x70c   : > { %v2480_v52 = vpop.f32.mrb[4].mxu0  ;;  %v2488_v53 = vpop.f32.mrb[4].mxu1 }
 0x70d   : > { %v1787_v57 = vadd.f32 %v2480_v52, %v3588_v21  ;;  %v1778_v58 = vpop.f32.mrb[5].mxu0  ;;  %v1810_v60 = vpop.f32.mrb[5].mxu1  ;;  %v1819_v15 = vadd.f32 %v2488_v53, %v3588_v21 }
 0x70e   : > { %v2481_v61 = vpop.f32.mrb[6].mxu0  ;;  %v2489_v62 = vpop.f32.mrb[6].mxu1  ;;  %v1779_v0 = vadd.f32 %v3588_v21, %v1778_v58  ;;  %v1811_v9 = vadd.f32 %v3588_v21, %v1810_v60 }
 0x70f   : > { %v1790_v1 = vadd.f32 %v2481_v61, %v3588_v21  ;;  %v1781_v2 = vpop.f32.mrb[7].mxu0  ;;  %v1813_v3 = vpop.f32.mrb[7].mxu1  ;;  %v3635_v4 = vadd.f32 %v1831_v54, %v1787_v57  ;;  %v1822_v56 = vadd.f32 %v2489_v62, %v3588_v21  ;;  %v3664_v20 = vadd.f32 %v1839_v17, %v1819_v15 }
 0x710   : > { %v1782_v6 = vadd.f32 %v3588_v21, %v1781_v2  ;;  %v3645_v10 = vadd.f32 %v1829_v5, %v1779_v0  ;;  %v1814_v12 = vadd.f32 %v3588_v21, %v1813_v3  ;;  %v3655_v16 = vadd.f32 %v1837_v11, %v1811_v9 }
 0x711   : > { %1869 = vadd.xlane.f32.xlu1 %v3635_v4  ;;  %v3640_v7 = vadd.f32 %v1832_v63, %v1790_v1  ;;  %v3667_v22 = vadd.f32 %v1840_v19, %v1822_v56 }
 0x712   : > { %v3650_v13 = vadd.f32 %v1830_v8, %v1782_v6  ;;  %v3660_v18 = vadd.f32 %v1838_v14, %v1814_v12 }
 0x713   : > { %1871 = vadd.xlane.f32.xlu0 %v3640_v7 }
 0x715   : > { %1865 = vadd.xlane.f32.xlu1 %v3645_v10 }
 0x717   : > { %1867 = vadd.xlane.f32.xlu0 %v3650_v13 }
 0x719   : > { %1881 = vadd.xlane.f32.xlu1 %v3655_v16 }
 0x71b   : > { %1883 = vadd.xlane.f32.xlu0 %v3660_v18 }
 0x71d   : > { %1885 = vadd.xlane.f32.xlu1 %v3664_v20 }
 0x71f   : > { %1887 = vadd.xlane.f32.xlu0 %v3667_v22 }
 0x786   : > { %v1878_v23 = vpop.xlane.xlu1 %1877  ;;  %v1862_v24 = vpop.xlane.xlu0 %1861 }
 0x787   : > { %v1900_v25 = vmul.f32 0.0078125, %v1878_v23  ;;  %v1892_v26 = vmul.f32 0.0078125, %v1862_v24 }
 0x789   : > { %v3671_v21 = vsub.f32 %v3598_v36, %v1892_v26  ;;  %v3674_v30 = vsub.f32 %v3596_v43, %v1900_v25 }
 0x78a   : > { %v1874_v27 = vpop.xlane.xlu1 %1873  ;;  %v1858_v28 = vpop.xlane.xlu0 %1857 }
 0x78b   : > { %v1890_v31 = vmul.f32 0.0078125, %v1858_v28  ;;  %v1924_v32 = vmul.f32 %v3671_v21, %v3671_v21  ;;  %v1898_v33 = vmul.f32 0.0078125, %v1874_v27  ;;  %v1932_v36 = vmul.f32 %v3674_v30, %v3674_v30 }
 0x78d   : > { %1942 = vadd.xlane.f32.xlu1 %v1924_v32  ;;  %v3679_v35 = vsub.f32 %v3608_v46, %v1890_v31  ;;  %v3687_v43 = vsub.f32 %v3606_v40, %v1898_v33 }
 0x78e   : > { %v1864_v34 = vpop.xlane.xlu0 %1863  ;;  %v1860_v41 = vpop.xlane.xlu1 %1859 }
 0x78f   : > { %v1893_v38 = vmul.f32 0.0078125, %v1864_v34  ;;  %v1891_v45 = vmul.f32 0.0078125, %v1860_v41  ;;  %v1922_v29 = vmul.f32 %v3679_v35, %v3679_v35  ;;  %v1930_v51 = vmul.f32 %v3687_v43, %v3687_v43 }
 0x791   : > { %v3684_v44 = vsub.f32 %v3617_v50, %v1893_v38  ;;  %1958 = vadd.xlane.f32.xlu1 %v1932_v36  ;;  %v3697_v39 = vsub.f32 %v3615_v49, %v1891_v45 }
 0x792   : > { %v1880_v42 = vpop.xlane.xlu0 %1879 }
 0x793   : > { %v1901_v47 = vmul.f32 0.0078125, %v1880_v42  ;;  %v1925_v46 = vmul.f32 %v3684_v44, %v3684_v44 }
 0x795   : > { %v3694_v48 = vsub.f32 %v3623_v37, %v1901_v47  ;;  %1938 = vadd.xlane.f32.xlu1 %v1922_v29  ;;  %1944 = vadd.xlane.f32.xlu0 %v1925_v46  ;;  %v1923_v37 = vmul.f32 %v3697_v39, %v3697_v39  ;;  %v3753_v46 = vld [vmem:[%s3921_s21] ss:$0 sm:$0xff] }
 0x796   : > { %v1876_v50 = vpop.xlane.xlu0 %1875 }
 0x797   : > { %v1899_v40 = vmul.f32 0.0078125, %v1876_v50  ;;  %v1933_v55 = vmul.f32 %v3694_v48, %v3694_v48 }
 0x799   : > { %1954 = vadd.xlane.f32.xlu1 %v1930_v51  ;;  %1960 = vadd.xlane.f32.xlu0 %v1933_v55  ;;  %v3704_v52 = vsub.f32 %v3627_v59, %v1899_v40 }
 0x79b   : > { %v1931_v49 = vmul.f32 %v3704_v52, %v3704_v52 }
 0x79d   : > { %1940 = vadd.xlane.f32.xlu0 %v1923_v37  ;;  %v3759_v37 = vld [vmem:[%s3922_s7] ss:$0 sm:$0xff] }
 0x79e   : > { %v1870_v53 = vpop.xlane.xlu1 %1869 }
 0x79f   : > { %v1896_v54 = vmul.f32 0.0078125, %v1870_v53 }
 0x7a0   : > { %v1872_v57 = vpop.xlane.xlu0 %1871 }
 0x7a1   : > { %v3711_v58 = vsub.f32 %v3635_v4, %v1896_v54  ;;  %v1897_v60 = vmul.f32 0.0078125, %v1872_v57  ;;  %1956 = vadd.xlane.f32.xlu0 %v1931_v49 }
 0x7a2   : > { %v1866_v61 = vpop.xlane.xlu1 %1865 }
 0x7a3   : > { %v3714_v62 = vsub.f32 %v3640_v7, %v1897_v60  ;;  %v1894_v59 = vmul.f32 0.0078125, %v1866_v61  ;;  %v1928_v63 = vmul.f32 %v3711_v58, %v3711_v58 }
 0x7a4   : > { %v1868_v0 = vpop.xlane.xlu0 %1867 }
 0x7a5   : > { %v3719_v1 = vsub.f32 %v3645_v10, %v1894_v59  ;;  %v1895_v2 = vmul.f32 0.0078125, %v1868_v0  ;;  %1950 = vadd.xlane.f32.xlu1 %v1928_v63  ;;  %v1929_v3 = vmul.f32 %v3714_v62, %v3714_v62 }
 0x7a6   : > { %v1882_v4 = vpop.xlane.xlu1 %1881 }
 0x7a7   : > { %v3724_v5 = vsub.f32 %v3650_v13, %v1895_v2  ;;  %v1902_v6 = vmul.f32 0.0078125, %v1882_v4  ;;  %1952 = vadd.xlane.f32.xlu0 %v1929_v3  ;;  %v1926_v7 = vmul.f32 %v3719_v1, %v3719_v1 }
 0x7a8   : > { %v1884_v8 = vpop.xlane.xlu0 %1883 }
 0x7a9   : > { %v3729_v9 = vsub.f32 %v3655_v16, %v1902_v6  ;;  %v1903_v10 = vmul.f32 0.0078125, %v1884_v8  ;;  %1946 = vadd.xlane.f32.xlu1 %v1926_v7  ;;  %v1927_v11 = vmul.f32 %v3724_v5, %v3724_v5 }
 0x7aa   : > { %v1886_v12 = vpop.xlane.xlu1 %1885 }
 0x7ab   : > { %v3734_v14 = vsub.f32 %v3660_v18, %v1903_v10  ;;  %v1904_v13 = vmul.f32 0.0078125, %v1886_v12  ;;  %1948 = vadd.xlane.f32.xlu0 %v1927_v11  ;;  %v1934_v15 = vmul.f32 %v3729_v9, %v3729_v9 }
 0x7ac   : > { %v1888_v17 = vpop.xlane.xlu0 %1887 }
 0x7ad   : > { %v3739_v56 = vsub.f32 %v3664_v20, %v1904_v13  ;;  %v1905_v16 = vmul.f32 0.0078125, %v1888_v17  ;;  %1962 = vadd.xlane.f32.xlu1 %v1934_v15  ;;  %v1935_v19 = vmul.f32 %v3734_v14, %v3734_v14 }
 0x7af   : > { %v3744_v23 = vsub.f32 %v3667_v22, %v1905_v16  ;;  %1964 = vadd.xlane.f32.xlu0 %v1935_v19  ;;  %v1936_v18 = vmul.f32 %v3739_v56, %v3739_v56 }
 0x7b1   : > { %1966 = vadd.xlane.f32.xlu1 %v1936_v18  ;;  %v1937_v24 = vmul.f32 %v3744_v23, %v3744_v23 }
 0x7b3   : > { %1968 = vadd.xlane.f32.xlu0 %v1937_v24 }
 0x81a   : > { %v1943_v25 = vpop.xlane.xlu1 %1942 }
 0x81b   : > { %v1972_v20 = vmul.f32 0.0078125, %v1943_v25 }
 0x81d   : > { %v1988_v26 = vadd.f32 1e-12, %v1972_v20 }
 0x81e   : > { %v1959_v27 = vpop.xlane.xlu1 %1958 }
 0x81f   : > { %2734 = vrsqrt.f32 %v1988_v26  ;;  %v1980_v28 = vmul.f32 0.0078125, %v1959_v27 }
 0x821   : > { %v1996_v31 = vadd.f32 1e-12, %v1980_v28 }
 0x822   : > { %v1939_v32 = vpop.xlane.xlu1 %1938  ;;  %v1945_v33 = vpop.xlane.xlu0 %1944 }
 0x823   : > { %2736 = vrsqrt.f32 %v1996_v31  ;;  %v1970_v22 = vmul.f32 0.0078125, %v1939_v32  ;;  %v1973_v34 = vmul.f32 0.0078125, %v1945_v33 }
 0x825   : > { %v1986_v38 = vadd.f32 1e-12, %v1970_v22  ;;  %v1989_v36 = vadd.f32 1e-12, %v1973_v34 }
 0x826   : > { %v1955_v41 = vpop.xlane.xlu1 %1954  ;;  %v1961_v42 = vpop.xlane.xlu0 %1960 }
 0x827   : > { %2738 = vrsqrt.f32 %v1986_v38  ;;  %v1978_v45 = vmul.f32 0.0078125, %v1955_v41  ;;  %v1981_v47 = vmul.f32 0.0078125, %v1961_v42 }
 0x828   : > { %2740 = vrsqrt.f32 %v1989_v36 }
 0x829   : > { %v2735_v29 = vpop.eup %2734  ;;  %v1994_v50 = vadd.f32 1e-12, %v1978_v45  ;;  %v1997_v40 = vadd.f32 1e-12, %v1981_v47 }
 0x82a   : > { %v2020_v51 = vmul.f32 %v2735_v29, %v3671_v21  ;;  %v1941_v55 = vpop.xlane.xlu0 %1940 }
 0x82b   : > { %2742 = vrsqrt.f32 %v1994_v50  ;;  %v1971_v53 = vmul.f32 0.0078125, %v1941_v55 }
 0x82c   : > { %v2043_v54 = vmul.f32 %v3753_v46, %v2020_v51  ;;  %2744 = vrsqrt.f32 %v1997_v40 }
 0x82d   : > { %v2737_v49 = vpop.eup %2736  ;;  %v1987_v57 = vadd.f32 1e-12, %v1971_v53 }
 0x82e   : > { %v2066_v60 = vadd.f32 %v3759_v37, %v2043_v54  ;;  %v2028_v61 = vmul.f32 %v2737_v49, %v3674_v30  ;;  %v1957_v59 = vpop.xlane.xlu0 %1956 }
 0x82f   : > { %2746 = vrsqrt.f32 %v1987_v57  ;;  %v1979_v21 = vmul.f32 0.0078125, %v1957_v59 }
 0x830   : > { %2082 = vst [vmem:[%s3242_s23 + $0x10] sm:$0xff] %v2066_v60  ;;  %v2051_v63 = vmul.f32 %v3753_v46, %v2028_v61 }
 0x831   : > { %v2739_v0 = vpop.eup %2738  ;;  %v1995_v2 = vadd.f32 1e-12, %v1979_v21 }
 0x832   : > { %v2741_v3 = vpop.eup %2740  ;;  %v2074_v4 = vadd.f32 %v3759_v37, %v2051_v63  ;;  %v2018_v6 = vmul.f32 %v2739_v0, %v3679_v35  ;;  %v1951_v7 = vpop.xlane.xlu1 %1950 }
 0x833   : > { %v2021_v8 = vmul.f32 %v2741_v3, %v3684_v44  ;;  %2748 = vrsqrt.f32 %v1995_v2  ;;  %v1976_v10 = vmul.f32 0.0078125, %v1951_v7 }
 0x834   : > { %2090 = vst [vmem:[%s3242_s23 + $0x50] sm:$0xff] %v2074_v4  ;;  %v2041_v30 = vmul.f32 %v3753_v46, %v2018_v6  ;;  %v1953_v11 = vpop.xlane.xlu0 %1952 }
 0x835   : > { %v2743_v12 = vpop.eup %2742  ;;  %v2044_v13 = vmul.f32 %v3753_v46, %v2021_v8  ;;  %v1992_v15 = vadd.f32 1e-12, %v1976_v10  ;;  %v1977_v17 = vmul.f32 0.0078125, %v1953_v11 }
 0x836   : > { %v2745_v16 = vpop.eup %2744  ;;  %v2064_v19 = vadd.f32 %v3759_v37, %v2041_v30  ;;  %v2026_v35 = vmul.f32 %v2743_v12, %v3687_v43  ;;  %v1947_v18 = vpop.xlane.xlu1 %1946 }
 0x837   : > { %v2067_v44 = vadd.f32 %v3759_v37, %v2044_v13  ;;  %v2029_v24 = vmul.f32 %v2745_v16, %v3694_v48  ;;  %2750 = vrsqrt.f32 %v1992_v15  ;;  %v1993_v25 = vadd.f32 1e-12, %v1977_v17 }
 0x838   : > { %2080 = vst [vmem:[%s3242_s23] sm:$0xff] %v2064_v19  ;;  %v2049_v20 = vmul.f32 %v3753_v46, %v2026_v35  ;;  %v1974_v26 = vmul.f32 0.0078125, %v1947_v18  ;;  %v1949_v27 = vpop.xlane.xlu0 %1948 }
 0x839   : > { %v2747_v28 = vpop.eup %2746  ;;  %2083 = vst [vmem:[%s3242_s23 + $0x18] sm:$0xff] %v2067_v44  ;;  %v2052_v31 = vmul.f32 %v3753_v46, %v2029_v24  ;;  %2752 = vrsqrt.f32 %v1993_v25  ;;  %v1975_v43 = vmul.f32 0.0078125, %v1949_v27 }
 0x83a   : > { %v2072_v32 = vadd.f32 %v3759_v37, %v2049_v20  ;;  %v2019_v33 = vmul.f32 %v2747_v28, %v3697_v39  ;;  %v1990_v48 = vadd.f32 1e-12, %v1974_v26  ;;  %v1963_v22 = vpop.xlane.xlu1 %1962 }
 0x83b   : > { %v2075_v34 = vadd.f32 %v3759_v37, %v2052_v31  ;;  %v1991_v38 = vadd.f32 1e-12, %v1975_v43  ;;  %v1982_v36 = vmul.f32 0.0078125, %v1963_v22 }
 0x83c   : > { %2088 = vst [vmem:[%s3242_s23 + $0x40] sm:$0xff] %v2072_v32  ;;  %v2042_v41 = vmul.f32 %v3753_v46, %v2019_v33  ;;  %2754 = vrsqrt.f32 %v1990_v48  ;;  %v1965_v42 = vpop.xlane.xlu0 %1964 }
 0x83d   : > { %v2749_v45 = vpop.eup %2748  ;;  %2091 = vst [vmem:[%s3242_s23 + $0x58] sm:$0xff] %v2075_v34  ;;  %2756 = vrsqrt.f32 %v1991_v38  ;;  %v1998_v47 = vadd.f32 1e-12, %v1982_v36  ;;  %v1983_v29 = vmul.f32 0.0078125, %v1965_v42 }
 0x83e   : > { %v2065_v50 = vadd.f32 %v3759_v37, %v2042_v41  ;;  %v2027_v39 = vmul.f32 %v2749_v45, %v3704_v52  ;;  %v1967_v40 = vpop.xlane.xlu1 %1966 }
 0x83f   : > { %2758 = vrsqrt.f32 %v1998_v47  ;;  %v1999_v51 = vadd.f32 1e-12, %v1983_v29  ;;  %v1984_v55 = vmul.f32 0.0078125, %v1967_v40 }
 0x840   : > { %2081 = vst [vmem:[%s3242_s23 + $0x8] sm:$0xff] %v2065_v50  ;;  %v2050_v53 = vmul.f32 %v3753_v46, %v2027_v39  ;;  %v1969_v54 = vpop.xlane.xlu0 %1968 }
 0x841   : > { %v2751_v49 = vpop.eup %2750  ;;  %2760 = vrsqrt.f32 %v1999_v51  ;;  %v2000_v57 = vadd.f32 1e-12, %v1984_v55  ;;  %v1985_v60 = vmul.f32 0.0078125, %v1969_v54 }
 0x842   : > { %v2073_v61 = vadd.f32 %v3759_v37, %v2050_v53  ;;  %v2024_v59 = vmul.f32 %v2751_v49, %v3711_v58 }
 0x843   : > { %v2753_v21 = vpop.eup %2752  ;;  %2762 = vrsqrt.f32 %v2000_v57  ;;  %v2001_v52 = vadd.f32 1e-12, %v1985_v60 }
 0x844   : > { %2089 = vst [vmem:[%s3242_s23 + $0x48] sm:$0xff] %v2073_v61  ;;  %v2047_v63 = vmul.f32 %v3753_v46, %v2024_v59  ;;  %v2025_v0 = vmul.f32 %v2753_v21, %v3714_v62 }
 0x845   : > { %2764 = vrsqrt.f32 %v2001_v52 }
 0x846   : > { %v2755_v2 = vpop.eup %2754  ;;  %v2070_v3 = vadd.f32 %v3759_v37, %v2047_v63  ;;  %v2048_v4 = vmul.f32 %v3753_v46, %v2025_v0 }
 0x847   : > { %v2757_v6 = vpop.eup %2756  ;;  %v2022_v7 = vmul.f32 %v2755_v2, %v3719_v1 }
 0x848   : > { %2086 = vst [vmem:[%s3242_s23 + $0x30] sm:$0xff] %v2070_v3  ;;  %v2071_v58 = vadd.f32 %v3759_v37, %v2048_v4  ;;  %v2023_v8 = vmul.f32 %v2757_v6, %v3724_v5 }
 0x849   : > { %v2759_v10 = vpop.eup %2758  ;;  %v2045_v30 = vmul.f32 %v3753_v46, %v2022_v7 }
 0x84a   : > { %2087 = vst [vmem:[%s3242_s23 + $0x38] sm:$0xff] %v2071_v58  ;;  %v2046_v62 = vmul.f32 %v3753_v46, %v2023_v8  ;;  %v2030_v11 = vmul.f32 %v2759_v10, %v3729_v9 }
 0x84b   : > { %v2761_v12 = vpop.eup %2760  ;;  %v2068_v13 = vadd.f32 %v3759_v37, %v2045_v30 }
 0x84c   : > { %v2069_v1 = vadd.f32 %v3759_v37, %v2046_v62  ;;  %v2053_v15 = vmul.f32 %v3753_v46, %v2030_v11  ;;  %v2031_v5 = vmul.f32 %v2761_v12, %v3734_v14 }
 0x84d   : > { %v2763_v17 = vpop.eup %2762  ;;  %2084 = vst [vmem:[%s3242_s23 + $0x20] sm:$0xff] %v2068_v13 }
 0x84e   : > { %2085 = vst [vmem:[%s3242_s23 + $0x28] sm:$0xff] %v2069_v1  ;;  %v2076_v16 = vadd.f32 %v3759_v37, %v2053_v15  ;;  %v2054_v19 = vmul.f32 %v3753_v46, %v2031_v5  ;;  %v2032_v9 = vmul.f32 %v2763_v17, %v3739_v56 }
 0x84f   : > { %v2765_v35 = vpop.eup %2764 }
 0x850   : > { %2092 = vst [vmem:[%s3242_s23 + $0x60] sm:$0xff] %v2076_v16  ;;  %v2077_v18 = vadd.f32 %v3759_v37, %v2054_v19  ;;  %v2055_v44 = vmul.f32 %v3753_v46, %v2032_v9  ;;  %v2033_v24 = vmul.f32 %v2765_v35, %v3744_v23 }
 0x852   : > { %2093 = vst [vmem:[%s3242_s23 + $0x68] sm:$0xff] %v2077_v18  ;;  %v2078_v14 = vadd.f32 %v3759_v37, %v2055_v44  ;;  %v2056_v25 = vmul.f32 %v3753_v46, %v2033_v24 }
 0x854   : > { %2094 = vst [vmem:[%s3242_s23 + $0x70] sm:$0xff] %v2078_v14  ;;  %v2079_v20 = vadd.f32 %v3759_v37, %v2056_v25 }
 0x856   : > { %2095 = vst [vmem:[%s3242_s23 + $0x78] sm:$0xff] %v2079_v20 }
 0x857 PF: > { %s2297_s8 = sshll.u32 %s2942_s9, 11  ;;  %s3923_s25 = sld [smem:[#allocation19_spill]] }
 0x858   : > { %s2110_s30 = sshll.u32 %s3242_s23, 4  ;;  %s2097_s13 = scalar_lea.sflag [#allocation6], %s3220_s6  ;;  %s3831_s30 = int_to_ptr.vmem [resolvable:$true] %s2110_s30 }
 0x859   : > { %s2852_s20 = scalar_lea.vmem %s3831_s30, 2048  ;;  %s2974_s24 = smov [#allocation10]  }
 0x85a   : > { %p2853_p8 = scmp.ne.s32.totalorder %s3831_s30, %s2852_s20  ;;  %s2856_s14 = sshll.u32 %s2974_s24, 4  ;;  %s2857_s14 = int_to_ptr.vmem [resolvable:$false] %s2856_s14 }
 0x85b   : > { %s2858_s9 = scalar_lea.vmem %s2857_s14, 4096  ;;  %p2859_p7 = scmp.lt.s32.totalorder %s3831_s30, %s2857_s14 }
 0x85c   : > { %p2854_p13 = pnand %p2853_p8, %p3162_p6  ;;  %p2860_p12 = scmp.lt.s32.totalorder %s2858_s9, %s2852_s20 }
 0x85d   : > { %s3828_s17 = scalar_lea.hbm %s3923_s25, %s2297_s8 }
 0x85e   : > { %p2855_p3 = pneg %p2854_p13  ;;  %p2861_p11 = por %p2860_p12, %p2859_p7 }
 0x860   : > { %p2862_p1 = pnand %p2861_p11, %p2855_p3 }
 0x862   : > { %2865 = shalt.err (!%p2862_p1)
}
 0x863   : > { %s2866_s23 = scalar_lea.hbm %s3828_s17, 2048  ;;  %s2870_s18 = scalar_lea.hbm %s3923_s25, 4096 }
 0x864   : > { %p2867_p5 = scmp.ne.s32.totalorder %s3828_s17, %s2866_s23  ;;  %p2871_p2 = scmp.lt.u32.totalorder %s3828_s17, %s3923_s25 }
 0x865   : > { %p2872_p4 = scmp.lt.u32.totalorder %s2870_s18, %s2866_s23  ;;  %p2874_p8 = scmp.lt.u32.totalorder %s2866_s23, %s3828_s17 }
 0x866   : > { %p2868_p9 = pnand %p2867_p5, %p3162_p6 }
 0x867   : > { %p2873_p10 = por %p2872_p4, %p2871_p2 }
 0x868   : > { %p2869_p0 = pneg %p2868_p9 }
 0x869   : > { %p2875_p13 = por %p2874_p8, %p2873_p10 }
 0x86b   : > { %p2876_p3 = pnand %p2875_p13, %p2869_p0 }
 0x86d   : > { %2879 = shalt.err (!%p2876_p3)
}
 0x86e   : > { %s2975_s15 = smov 128   ;;  %s2976_s19 = smov 8  }
 0x86f   : > { %2524 = dma.vmem_to_hbm [thread:$0]  (%p3162_p6), %s3831_s30, 2048, %s3828_s17, %s2097_s13, %s2975_s15, %s2975_s15, %s2976_s19  }
 0x870 PF: > { %s3924_s20 = sld [smem:[#allocation14_spill]]  ;;  %s3925_s24 = sld [smem:[#allocation15_spill]] }
 0x871   : > { %p2546_p7 = scmp.ge.s32.totalorder %s2954_s12, 2 }
 0x876   : > { %s2125_s14 = sand.u32 1, %s3924_s20   ;;  %p3926_p12 = scmp.ne.s32.totalorder %s3925_s24, 0 }
 0x877   : > { %s2126_s9 = scalar_lea.sflag [#allocation6], %s2125_s14 }
 0x878   : > { %p2538_p11 = pnand %p2546_p7, %p3926_p12 }
 0x87a   : > { %2921 = dma.done.wait (!%p2538_p11), %s2126_s9, 2048  }
 0x87b   : > { %2923 = vsyncadd (!%p2538_p11), %s2126_s9, 4294965248  ;;  %s25_s12 = sadd.s32 1, %s2954_s12   ;;  %s3927_s22 = smov %s3940_s27 }
 0x87c   : > { %p22_p1 = scmp.ge.s32.totalorder %s25_s12, 10   ;;  %s3928_s27 = smov %s2930_s28 }
 0x87d   : > { %s3929_s28 = smov %s2934_s29  ;;  %s3930_s29 = smov %s3185_s2 }
 0x87e   : > { %s3931_s30 = smov %s2946_s10  ;;  %s3932_s9 = smov %s2950_s11 }
 0x87f   : > { %s3933_s10 = smov %s3936_s26  ;;  %s3934_s11 = smov %s3927_s22 }
 0x880   :  { %24 = sbr.rel (!%p22_p1) target bundleno = 13 (0xd), region = 124 }
 0x887   :  { %2131 = vsyncpa [#allocation5], 1 }
 0x888   :  { %2133 = vsyncpa [#allocation5 + $0x1], 1 }
 0x889   :  { %2134 = vsyncpa [#allocation8], 1 }
 0x88a   :  { %2135 = vsyncpa [#allocation6], 1 }
 0x88b   :  { %2137 = vsyncpa [#allocation6 + $0x1], 1 }

</bundles_post_ra>
